<compile_context>
chip_gen: v7x
topology: tpu7x:2x2x1
jax: 0.10.0
libtpu: 0.0.40
codegen_flags: <defaults>
</compile_context>

<pallas_src>
import jax
import jax.numpy as jnp
from jax.experimental import pallas as pl
from jax.experimental.pallas import tpu as pltpu

D_IN, H1, H2, H3, D_OUT = 2048, 512, 128, 64, 1


def _mlp_kernel(x_ref, w1_ref, b1_ref, w2_ref, b2_ref, w3_ref, b3_ref,
                w4_ref, b4_ref, out_ref):
    # Layer 1: Linear(2048, 512) + ReLU.  bf16 MXU inputs, f32 accumulate.
    h = jnp.dot(x_ref[...].astype(jnp.bfloat16), w1_ref[...],
                preferred_element_type=jnp.float32)
    h = jnp.maximum(h + b1_ref[...], 0.0)
    # (Dropout -> identity at inference)

    # Layer 2: Linear(512, 128) + ReLU
    h = jnp.dot(h.astype(jnp.bfloat16), w2_ref[...],
                preferred_element_type=jnp.float32)
    h = jnp.maximum(h + b2_ref[...], 0.0)
    # (Dropout(0.4) -> identity at inference)

    # Layer 3: Linear(128, 64) + ReLU
    h = jnp.dot(h.astype(jnp.bfloat16), w3_ref[...],
                preferred_element_type=jnp.float32)
    h = jnp.maximum(h + b3_ref[...], 0.0)

    # Age head: Linear(64, 1) + Sigmoid.  An N=1 matmul wastes the MXU, so do
    # it on the VPU: broadcast multiply by the (1, 64) weight row, lane-reduce.
    logits = jnp.sum(h * w4_ref[...], axis=-1, keepdims=True) + b4_ref[...]
    out_ref[...] = jax.nn.sigmoid(logits).astype(out_ref.dtype)


def _choose_tile_b(batch):
    """Single block for small batches; 256-row tiles for large ones."""
    b_pad8 = ((batch + 7) // 8) * 8   # sublane granularity
    return min(b_pad8, 256)


def age_gender_classifier(x, params, *, tile_b=None):
    """x: (B, 2048) float32 -> (B, 1) float32 in (0, 1)."""
    B = x.shape[0]
    w1, b1, w2, b2, w3, b3, w4, b4 = params

    if tile_b is None:
        tile_b = _choose_tile_b(B)

    # Pad the batch up to a multiple of the tile.
    pad = (-B) % tile_b
    if pad:
        x = jnp.pad(x, ((0, pad), (0, 0)))
    b_padded = B + pad
    grid = (b_padded // tile_b,)

    # Weights / biases: constant block index across the batch grid -> fetched
    # once and kept VMEM-resident while x tiles stream through.
    wspec = lambda shape: pl.BlockSpec(shape, lambda i: (0, 0))

    out = pl.pallas_call(
        _mlp_kernel,
        out_shape=jax.ShapeDtypeStruct((b_padded, D_OUT), jnp.float32),
        grid=grid,
        in_specs=[
            pl.BlockSpec((tile_b, D_IN), lambda i: (i, 0)),   # x: tiled over B
            wspec((D_IN, H1)), wspec((1, H1)),
            wspec((H1, H2)), wspec((1, H2)),
            wspec((H2, H3)), wspec((1, H3)),
            wspec((1, H3)),                                    # w4 row (VPU head)
            wspec((1, D_OUT)),
        ],
        out_specs=pl.BlockSpec((tile_b, D_OUT), lambda i: (i, 0)),
        compiler_params=pltpu.CompilerParams(
            dimension_semantics=("parallel",),
            vmem_limit_bytes=32 << 20),
    )(x, w1, b1, w2, b2, w3, b3, w4, b4)

    return out[:B] if pad else out


def init_params(key):
    """Deterministic synthetic parameters matching nn.Linear shapes.

    W1..W3 are stored transposed (in, out) and cast to bf16 (MXU inputs);
    biases stay f32; W4 is stored as a (1, 64) f32 row for the VPU head.
    """
    keys = jax.random.split(key, 8)
    dims = [(D_IN, H1), (H1, H2), (H2, H3), (H3, D_OUT)]
    raw = []
    for i, (din, dout) in enumerate(dims):
        scale = 1.0 / jnp.sqrt(jnp.float32(din))
        w = jax.random.uniform(keys[2 * i], (din, dout), jnp.float32,
                               -scale, scale)
        b = jax.random.uniform(keys[2 * i + 1], (1, dout), jnp.float32,
                               -scale, scale)
        raw += [w, b]
    w1, b1, w2, b2, w3, b3, w4, b4 = raw
    return (w1.astype(jnp.bfloat16), b1,
            w2.astype(jnp.bfloat16), b2,
            w3.astype(jnp.bfloat16), b3,
            w4.T,                       # (1, 64) f32 row
            b4)                         # (1, 1) f32


def reference(x, params):
    """Pure-JAX reference using the same (bf16-rounded) stored weights."""
    w1, b1, w2, b2, w3, b3, w4_row, b4 = params
    h = jnp.maximum(x @ w1.astype(jnp.float32) + b1, 0.0)
    h = jnp.maximum(h @ w2.astype(jnp.float32) + b2, 0.0)
    h = jnp.maximum(h @ w3.astype(jnp.float32) + b3, 0.0)
    return jax.nn.sigmoid(h @ w4_row.T + b4)


if __name__ == "__main__":
    key = jax.random.PRNGKey(0)
    k_x, k_p = jax.random.split(key)

    B = 32  # small batch; feature dim fixed at 2048 by the module
    x = jax.random.normal(k_x, (B, D_IN), dtype=jnp.float32)
    params = init_params(k_p)

    # Adaptive tile: B=32 runs as a single grid step.
    out = age_gender_classifier(x, params)
    out = jax.block_until_ready(out)

    # Also exercise the multi-step (tiled) path for correctness.
    out_tiled = jax.block_until_ready(
        age_gender_classifier(x, params, tile_b=8))

    ref = reference(x, params)
    assert out.shape == (B, D_OUT)
    # bf16 MXU inputs inside the kernel (reference runs f32) -> loosened tol.
    assert jnp.allclose(out, ref, atol=2e-2, rtol=2e-2)
    assert jnp.allclose(out_tiled, ref, atol=2e-2, rtol=2e-2)

    print("KERNEL_OK")
</pallas_src>

<mosaic_0001>
module attributes {stable_mosaic.version = 11 : i64} {
  func.func @_mlp_kernel(%arg0: i32, %arg1: memref<32x2048xf32, #tpu.memory_space<vmem>>, %arg2: memref<2048x512xbf16, #tpu.memory_space<vmem>>, %arg3: memref<1x512xf32, #tpu.memory_space<vmem>>, %arg4: memref<512x128xbf16, #tpu.memory_space<vmem>>, %arg5: memref<1x128xf32, #tpu.memory_space<vmem>>, %arg6: memref<128x64xbf16, #tpu.memory_space<vmem>>, %arg7: memref<1x64xf32, #tpu.memory_space<vmem>>, %arg8: memref<1x64xf32, #tpu.memory_space<vmem>>, %arg9: memref<1x1xf32, #tpu.memory_space<vmem>>, %arg10: memref<32x1xf32, #tpu.memory_space<vmem>>) attributes {dimension_semantics = [#tpu.dimension_semantics<parallel>], iteration_bounds = array<i64: 1>, scalar_prefetch = 0 : i64, scratch_operands = 0 : i64, tpu.core_type = #tpu.core_type<tc>, window_params = [{transform_indices = @transform_0, window_bounds = array<i64: 32, 2048>}, {pipeline_mode = #tpu.pipeline_mode<synchronous>, transform_indices = @transform_1, window_bounds = array<i64: 2048, 512>}, {pipeline_mode = #tpu.pipeline_mode<synchronous>, transform_indices = @transform_2, window_bounds = array<i64: 1, 512>}, {pipeline_mode = #tpu.pipeline_mode<synchronous>, transform_indices = @transform_3, window_bounds = array<i64: 512, 128>}, {pipeline_mode = #tpu.pipeline_mode<synchronous>, transform_indices = @transform_4, window_bounds = array<i64: 1, 128>}, {pipeline_mode = #tpu.pipeline_mode<synchronous>, transform_indices = @transform_5, window_bounds = array<i64: 128, 64>}, {pipeline_mode = #tpu.pipeline_mode<synchronous>, transform_indices = @transform_6, window_bounds = array<i64: 1, 64>}, {pipeline_mode = #tpu.pipeline_mode<synchronous>, transform_indices = @transform_7, window_bounds = array<i64: 1, 64>}, {pipeline_mode = #tpu.pipeline_mode<synchronous>, transform_indices = @transform_8, window_bounds = array<i64: 1, 1>}, {transform_indices = @transform_9, window_bounds = array<i64: 32, 1>}]} {
    %c0 = arith.constant 0 : index
    %c0_0 = arith.constant 0 : index
    %0 = vector.load %arg1[%c0, %c0_0] : memref<32x2048xf32, #tpu.memory_space<vmem>>, vector<32x2048xf32>
    %1 = arith.truncf %0 : vector<32x2048xf32> to vector<32x2048xbf16>
    %c0_1 = arith.constant 0 : index
    %c0_2 = arith.constant 0 : index
    %2 = vector.load %arg2[%c0_1, %c0_2] : memref<2048x512xbf16, #tpu.memory_space<vmem>>, vector<2048x512xbf16>
    %cst = arith.constant dense<0.000000e+00> : vector<32x512xf32>
    %3 = tpu.matmul %1, %2, %cst {dimension_numbers = #tpu.dot_dimension_numbers<[1], [0], [0], [1], [0, 0, 1, 1], [], []>} : vector<32x2048xbf16>, vector<2048x512xbf16>, vector<32x512xf32> -> vector<32x512xf32>
    %c0_3 = arith.constant 0 : index
    %c0_4 = arith.constant 0 : index
    %4 = vector.load %arg3[%c0_3, %c0_4] : memref<1x512xf32, #tpu.memory_space<vmem>>, vector<1x512xf32>
    %5 = vector.broadcast %4 : vector<1x512xf32> to vector<32x512xf32>
    %6 = arith.addf %3, %5 : vector<32x512xf32>
    %cst_5 = arith.constant 0.000000e+00 : f32
    %7 = vector.broadcast %cst_5 : f32 to vector<32x512xf32>
    %8 = arith.maximumf %6, %7 : vector<32x512xf32>
    %9 = arith.truncf %8 : vector<32x512xf32> to vector<32x512xbf16>
    %c0_6 = arith.constant 0 : index
    %c0_7 = arith.constant 0 : index
    %10 = vector.load %arg4[%c0_6, %c0_7] : memref<512x128xbf16, #tpu.memory_space<vmem>>, vector<512x128xbf16>
    %cst_8 = arith.constant dense<0.000000e+00> : vector<32x128xf32>
    %11 = tpu.matmul %9, %10, %cst_8 {dimension_numbers = #tpu.dot_dimension_numbers<[1], [0], [0], [1], [0, 0, 1, 1], [], []>} : vector<32x512xbf16>, vector<512x128xbf16>, vector<32x128xf32> -> vector<32x128xf32>
    %c0_9 = arith.constant 0 : index
    %c0_10 = arith.constant 0 : index
    %12 = vector.load %arg5[%c0_9, %c0_10] : memref<1x128xf32, #tpu.memory_space<vmem>>, vector<1x128xf32>
    %13 = vector.broadcast %12 : vector<1x128xf32> to vector<32x128xf32>
    %14 = arith.addf %11, %13 : vector<32x128xf32>
    %cst_11 = arith.constant 0.000000e+00 : f32
    %15 = vector.broadcast %cst_11 : f32 to vector<32x128xf32>
    %16 = arith.maximumf %14, %15 : vector<32x128xf32>
    %17 = arith.truncf %16 : vector<32x128xf32> to vector<32x128xbf16>
    %c0_12 = arith.constant 0 : index
    %c0_13 = arith.constant 0 : index
    %18 = vector.load %arg6[%c0_12, %c0_13] : memref<128x64xbf16, #tpu.memory_space<vmem>>, vector<128x64xbf16>
    %cst_14 = arith.constant dense<0.000000e+00> : vector<32x64xf32>
    %19 = tpu.matmul %17, %18, %cst_14 {dimension_numbers = #tpu.dot_dimension_numbers<[1], [0], [0], [1], [0, 0, 1, 1], [], []>} : vector<32x128xbf16>, vector<128x64xbf16>, vector<32x64xf32> -> vector<32x64xf32>
    %c0_15 = arith.constant 0 : index
    %c0_16 = arith.constant 0 : index
    %20 = vector.load %arg7[%c0_15, %c0_16] : memref<1x64xf32, #tpu.memory_space<vmem>>, vector<1x64xf32>
    %21 = vector.broadcast %20 : vector<1x64xf32> to vector<32x64xf32>
    %22 = arith.addf %19, %21 : vector<32x64xf32>
    %cst_17 = arith.constant 0.000000e+00 : f32
    %23 = vector.broadcast %cst_17 : f32 to vector<32x64xf32>
    %24 = arith.maximumf %22, %23 : vector<32x64xf32>
    %c0_18 = arith.constant 0 : index
    %c0_19 = arith.constant 0 : index
    %25 = vector.load %arg8[%c0_18, %c0_19] : memref<1x64xf32, #tpu.memory_space<vmem>>, vector<1x64xf32>
    %26 = vector.broadcast %25 : vector<1x64xf32> to vector<32x64xf32>
    %27 = arith.mulf %24, %26 : vector<32x64xf32>
    %cst_20 = arith.constant dense<0.000000e+00> : vector<32xf32>
    %28 = vector.multi_reduction <add>, %27, %cst_20 [1] : vector<32x64xf32> to vector<32xf32>
    %29 = vector.shape_cast %28 : vector<32xf32> to vector<32x1xf32>
    %c0_21 = arith.constant 0 : index
    %c0_22 = arith.constant 0 : index
    %30 = vector.load %arg9[%c0_21, %c0_22] : memref<1x1xf32, #tpu.memory_space<vmem>>, vector<1x1xf32>
    %31 = vector.broadcast %30 : vector<1x1xf32> to vector<32x1xf32>
    %32 = arith.addf %29, %31 : vector<32x1xf32>
    %33 = arith.negf %32 : vector<32x1xf32>
    %34 = math.exp %33 : vector<32x1xf32>
    %cst_23 = arith.constant 1.000000e+00 : f32
    %35 = vector.broadcast %cst_23 : f32 to vector<32x1xf32>
    %36 = arith.addf %35, %34 : vector<32x1xf32>
    %37 = arith.divf %35, %36 : vector<32x1xf32>
    %c0_24 = arith.constant 0 : index
    %c0_25 = arith.constant 0 : index
    %38 = vector.load %arg10[%c0_24, %c0_25] : memref<32x1xf32, #tpu.memory_space<vmem>>, vector<32x1xf32>
    tpu.vector_store %arg10[%c0_24, %c0_25], %37 {strides = array<i32>} : memref<32x1xf32, #tpu.memory_space<vmem>>, vector<32x1xf32>,
    return
  }
  func.func @transform_0(%arg0: i32) -> (i32, i32) {
    %c0_i32 = arith.constant 0 : i32
    %c0_i32_0 = arith.constant 0 : i32
    return %arg0, %c0_i32 : i32, i32
  }
  func.func @transform_1(%arg0: i32) -> (i32, i32) {
    %c0_i32 = arith.constant 0 : i32
    %c0_i32_0 = arith.constant 0 : i32
    %c0_i32_1 = arith.constant 0 : i32
    return %c0_i32, %c0_i32_0 : i32, i32
  }
  func.func @transform_2(%arg0: i32) -> (i32, i32) {
    %c0_i32 = arith.constant 0 : i32
    %c0_i32_0 = arith.constant 0 : i32
    %c0_i32_1 = arith.constant 0 : i32
    return %c0_i32, %c0_i32_0 : i32, i32
  }
  func.func @transform_3(%arg0: i32) -> (i32, i32) {
    %c0_i32 = arith.constant 0 : i32
    %c0_i32_0 = arith.constant 0 : i32
    %c0_i32_1 = arith.constant 0 : i32
    return %c0_i32, %c0_i32_0 : i32, i32
  }
  func.func @transform_4(%arg0: i32) -> (i32, i32) {
    %c0_i32 = arith.constant 0 : i32
    %c0_i32_0 = arith.constant 0 : i32
    %c0_i32_1 = arith.constant 0 : i32
    return %c0_i32, %c0_i32_0 : i32, i32
  }
  func.func @transform_5(%arg0: i32) -> (i32, i32) {
    %c0_i32 = arith.constant 0 : i32
    %c0_i32_0 = arith.constant 0 : i32
    %c0_i32_1 = arith.constant 0 : i32
    return %c0_i32, %c0_i32_0 : i32, i32
  }
  func.func @transform_6(%arg0: i32) -> (i32, i32) {
    %c0_i32 = arith.constant 0 : i32
    %c0_i32_0 = arith.constant 0 : i32
    %c0_i32_1 = arith.constant 0 : i32
    return %c0_i32, %c0_i32_0 : i32, i32
  }
  func.func @transform_7(%arg0: i32) -> (i32, i32) {
    %c0_i32 = arith.constant 0 : i32
    %c0_i32_0 = arith.constant 0 : i32
    %c0_i32_1 = arith.constant 0 : i32
    return %c0_i32, %c0_i32_0 : i32, i32
  }
  func.func @transform_8(%arg0: i32) -> (i32, i32) {
    %c0_i32 = arith.constant 0 : i32
    %c0_i32_0 = arith.constant 0 : i32
    %c0_i32_1 = arith.constant 0 : i32
    return %c0_i32, %c0_i32_0 : i32, i32
  }
  func.func @transform_9(%arg0: i32) -> (i32, i32) {
    %c0_i32 = arith.constant 0 : i32
    %c0_i32_0 = arith.constant 0 : i32
    return %arg0, %c0_i32 : i32, i32
  }
}

</mosaic_0001>

<bundles_post_ra>
// kernel: tpu_custom_call.1
= control target key start
LH: loop header
LB: loop body
LE: loop exit
PB: predicated region body
PF: predicated region fallthrough
CT: control target
= control target key end

     0   :  { %s6713_s0 = inlined_call_operand.hbm [shape: f32[32,2048], index: 0, kind: input, shape index: {}]   ;;  %s6714_s1 = inlined_call_operand.hbm [shape: bf16[2048,512], index: 1, kind: input, shape index: {}]   ;;  %s6715_s2 = inlined_call_operand.hbm [shape: f32[1,512], index: 2, kind: input, shape index: {}]   ;;  %s6716_s3 = inlined_call_operand.hbm [shape: bf16[512,128], index: 3, kind: input, shape index: {}]   ;;  %s6717_s4 = inlined_call_operand.hbm [shape: f32[1,128], index: 4, kind: input, shape index: {}]   ;;  %s6718_s5 = inlined_call_operand.vmem [shape: bf16[128,64], index: 5, kind: input, shape index: {}]   ;;  %s6719_s6 = inlined_call_operand.hbm [shape: f32[1,64], index: 6, kind: input, shape index: {}]   ;;  %s6720_s7 = inlined_call_operand.hbm [shape: f32[1,64], index: 7, kind: input, shape index: {}]   ;;  %s6721_s8 = inlined_call_operand.<no memory space> [shape: f32[1,1], index: 8, kind: input, shape index: {}]   ;;  %s6722_s9 = inlined_call_operand.vmem [shape: f32[32,1], index: 9, kind: output, shape index: {}]  }
   0x1   :  { %v14_v0 = vstv %s6721_s8 }
   0x2   :  { %15 = vst [vmem:[#allocation2] sm:$0x1] %v14_v0 }
   0x3   :  { %16 = vsyncpa [#allocation4], 0 }
   0x4   :  { %17 = vsyncpa [#allocation6], 0 }
   0x5   :  { %18 = vsyncpa [#allocation9], 0 }
   0x6   :  { %19 = vsyncpa [#allocation12], 0  ;;  %s6520_s11 = smov [#allocation5]   ;;  %s6358_s15 = scalar_lea.hbm %s6714_s1, 65536 }
   0x7   :  { %s37_s12 = sshll.u32 %s6520_s11, 4  ;;  %p6359_p0 = scmp.ne.s32.totalorder %s6714_s1, %s6358_s15  ;;  %s38_s12 = int_to_ptr.vmem [resolvable:$true] %s37_s12 }
   0x8   :  { %p6362_p1 = scmp.lt.u32.totalorder %s6358_s15, %s6714_s1 }
   0xa   :  { %p6364_p2 = pnand %p6362_p1, %p6359_p0 }
   0xc   :  { %6367 = shalt.err (!%p6364_p2)
}
   0xd   :  { %s6368_s8 = scalar_lea.vmem %s38_s12, 65536  ;;  %p6373_p4 = scmp.lt.s32.totalorder %s38_s12, %s38_s12 }
   0xe   :  { %p6369_p3 = scmp.ne.s32.totalorder %s38_s12, %s6368_s8  ;;  %p6374_p5 = scmp.lt.s32.totalorder %s6368_s8, %s6368_s8 }
  0x10   :  { %p6375_p6 = por %p6374_p5, %p6373_p4 }
  0x12   :  { %p6376_p7 = pnand %p6375_p6, %p6369_p3 }
  0x14   :  { %6379 = shalt.err (!%p6376_p7)
}
  0x15   :  { %s6521_s20 = smov 256   ;;  %s6522_s21 = smov 16  }
  0x16   :  { %43 = dma.hbm_to_vmem [thread:$0]  %s6714_s1, 65536, %s38_s12, [#allocation6], %s6521_s20, %s6521_s20, %s6522_s21  }
  0x17   :  { %s6523_s24 = smov [#allocation8]   ;;  %s6380_s28 = scalar_lea.hbm %s6716_s3, 4096 }
  0x18   :  { %s59_s25 = sshll.u32 %s6523_s24, 4  ;;  %p6381_p8 = scmp.ne.s32.totalorder %s6716_s3, %s6380_s28  ;;  %s60_s25 = int_to_ptr.vmem [resolvable:$true] %s59_s25 }
  0x19   :  { %p6384_p9 = scmp.lt.u32.totalorder %s6380_s28, %s6716_s3 }
  0x1b   :  { %p6386_p10 = pnand %p6384_p9, %p6381_p8 }
  0x1d   :  { %6389 = shalt.err (!%p6386_p10)
}
  0x1e   :  { %s6390_s13 = scalar_lea.vmem %s60_s25, 4096  ;;  %p6395_p12 = scmp.lt.s32.totalorder %s60_s25, %s60_s25 }
  0x1f   :  { %p6391_p11 = scmp.ne.s32.totalorder %s60_s25, %s6390_s13  ;;  %p6396_p13 = scmp.lt.s32.totalorder %s6390_s13, %s6390_s13 }
  0x21   :  { %p6397_p0 = por %p6396_p13, %p6395_p12 }
  0x23   :  { %p6398_p1 = pnand %p6397_p0, %p6391_p11 }
  0x25   :  { %6401 = shalt.err (!%p6398_p1)
}
  0x26   :  { %s6524_s1 = smov 64   ;;  %s6525_s12 = smov 4  }
  0x27   :  { %65 = dma.hbm_to_vmem [thread:$0]  %s6716_s3, 4096, %s60_s25, [#allocation9], %s6524_s1, %s6524_s1, %s6525_s12  }
  0x28   :  { %s6526_s16 = smov [#allocation11]   ;;  %s6527_s18 = smov [#allocation3]  }
  0x29   :  { %s84_s17 = sshll.u32 %s6526_s16, 4  ;;  %s25_s19 = sshll.u32 %s6527_s18, 4  ;;  %s85_s17 = int_to_ptr.vmem [resolvable:$true] %s84_s17  ;;  %s6610_s19 = int_to_ptr.vmem [resolvable:$true] %s25_s19 }
  0x2a   :  { %s6402_s21 = scalar_lea.hbm %s6719_s6, 16 }
  0x2b   :  { %p6403_p2 = scmp.ne.s32.totalorder %s6719_s6, %s6402_s21  ;;  %p6406_p3 = scmp.lt.u32.totalorder %s6402_s21, %s6719_s6 }
  0x2d   :  { %p6408_p4 = pnand %p6406_p3, %p6403_p2 }
  0x2f   :  { %6411 = shalt.err (!%p6408_p4)
}
  0x30   :  { %s6412_s3 = scalar_lea.vmem %s85_s17, 16  ;;  %s6416_s25 = scalar_lea.vmem %s85_s17, 32 }
  0x31   :  { %p6413_p5 = scmp.ne.s32.totalorder %s85_s17, %s6412_s3  ;;  %p6417_p6 = scmp.lt.s32.totalorder %s85_s17, %s85_s17 }
  0x32   :  { %p6418_p7 = scmp.lt.s32.totalorder %s6416_s25, %s6412_s3 }
  0x34   :  { %p6419_p8 = por %p6418_p7, %p6417_p6 }
  0x36   :  { %p6420_p9 = pnand %p6419_p8, %p6413_p5 }
  0x38   :  { %6423 = shalt.err (!%p6420_p9)
}
  0x39   :  { %87 = dma.hbm_to_vmem [thread:$0]  %s6719_s6, 16, %s85_s17, [#allocation12]  }
  0x3a   :  { %s6424_s10 = scalar_lea.hbm %s6713_s0, 8192 }
  0x3b   :  { %p6425_p10 = scmp.ne.s32.totalorder %s6713_s0, %s6424_s10  ;;  %p6428_p11 = scmp.lt.u32.totalorder %s6424_s10, %s6713_s0 }
  0x3d   :  { %p6430_p12 = pnand %p6428_p11, %p6425_p10 }
  0x3f   :  { %6433 = shalt.err (!%p6430_p12)
}
  0x40   :  { %s6434_s14 = scalar_lea.vmem %s6610_s19, 8192  ;;  %p6439_p0 = scmp.lt.s32.totalorder %s6610_s19, %s6610_s19 }
  0x41   :  { %p6435_p13 = scmp.ne.s32.totalorder %s6610_s19, %s6434_s14  ;;  %p6440_p1 = scmp.lt.s32.totalorder %s6434_s14, %s6434_s14 }
  0x43   :  { %p6441_p2 = por %p6440_p1, %p6439_p0 }
  0x45   :  { %p6442_p3 = pnand %p6441_p2, %p6435_p13 }
  0x47   :  { %6445 = shalt.err (!%p6442_p3)
}
  0x48   :  { %s6528_s6 = smov 2048   ;;  %s6529_s15 = smov 128  }
  0x49   :  { %31 = dma.hbm_to_vmem [thread:$0]  %s6713_s0, 8192, %s6610_s19, [#allocation4], %s6528_s6, %s6528_s6, %s6529_s15  }
  0x4a   :  { %s6530_s18 = smov [#allocation7]   ;;  %s6531_s20 = smov [#allocation10]  }
  0x4b   :  { %s50_s8 = sshll.u32 %s6530_s18, 4  ;;  %s72_s21 = sshll.u32 %s6531_s20, 4  ;;  %s51_s8 = int_to_ptr.vmem [resolvable:$true] %s50_s8  ;;  %s73_s21 = int_to_ptr.vmem [resolvable:$true] %s72_s21 }
  0x4c   :  { %s6446_s24 = scalar_lea.hbm %s6715_s2, 64 }
  0x4d   :  { %p6447_p4 = scmp.ne.s32.totalorder %s6715_s2, %s6446_s24  ;;  %p6450_p5 = scmp.lt.u32.totalorder %s6446_s24, %s6715_s2 }
  0x4f   :  { %p6452_p6 = pnand %p6450_p5, %p6447_p4 }
  0x51   :  { %6455 = shalt.err (!%p6452_p6)
}
  0x52   :  { %s6456_s0 = scalar_lea.vmem %s51_s8, 64  ;;  %p6461_p8 = scmp.lt.s32.totalorder %s51_s8, %s51_s8 }
  0x53   :  { %p6457_p7 = scmp.ne.s32.totalorder %s51_s8, %s6456_s0  ;;  %p6462_p9 = scmp.lt.s32.totalorder %s6456_s0, %s6456_s0 }
  0x55   :  { %p6463_p10 = por %p6462_p9, %p6461_p8 }
  0x57   :  { %p6464_p11 = pnand %p6463_p10, %p6457_p7 }
  0x59   :  { %6467 = shalt.err (!%p6464_p11)
}
  0x5a   :  { %53 = dma.hbm_to_vmem [thread:$0]  %s6715_s2, 64, %s51_s8, [#allocation6]  }
  0x5b   :  { %s6468_s10 = scalar_lea.hbm %s6717_s4, 16 }
  0x5c   :  { %p6469_p12 = scmp.ne.s32.totalorder %s6717_s4, %s6468_s10  ;;  %p6472_p13 = scmp.lt.u32.totalorder %s6468_s10, %s6717_s4 }
  0x5e   :  { %p6474_p0 = pnand %p6472_p13, %p6469_p12 }
  0x60   :  { %6477 = shalt.err (!%p6474_p0)
}
  0x61   :  { %s6478_s14 = scalar_lea.vmem %s73_s21, 16  ;;  %s6482_s6 = scalar_lea.vmem %s73_s21, 32 }
  0x62   :  { %p6479_p1 = scmp.ne.s32.totalorder %s73_s21, %s6478_s14  ;;  %p6483_p2 = scmp.lt.s32.totalorder %s73_s21, %s73_s21 }
  0x63   :  { %p6484_p3 = scmp.lt.s32.totalorder %s6482_s6, %s6478_s14 }
  0x65   :  { %p6485_p4 = por %p6484_p3, %p6483_p2 }
  0x67   :  { %p6486_p5 = pnand %p6485_p4, %p6479_p1 }
  0x69   :  { %6489 = shalt.err (!%p6486_p5)
}
  0x6a   :  { %75 = dma.hbm_to_vmem [thread:$0]  %s6717_s4, 16, %s73_s21, [#allocation9]  }
  0x6b   :  { %s6532_s16 = smov [#allocation13]   ;;  %s6490_s20 = scalar_lea.hbm %s6720_s7, 16 }
  0x6c   :  { %s94_s17 = sshll.u32 %s6532_s16, 4  ;;  %p6491_p6 = scmp.ne.s32.totalorder %s6720_s7, %s6490_s20  ;;  %s95_s17 = int_to_ptr.vmem [resolvable:$true] %s94_s17 }
  0x6d   :  { %p6494_p7 = scmp.lt.u32.totalorder %s6490_s20, %s6720_s7 }
  0x6f   :  { %p6496_p8 = pnand %p6494_p7, %p6491_p6 }
  0x71   :  { %6499 = shalt.err (!%p6496_p8)
}
  0x72   :  { %s6500_s3 = scalar_lea.vmem %s95_s17, 16  ;;  %s6504_s4 = scalar_lea.vmem %s95_s17, 32 }
  0x73   :  { %p6501_p9 = scmp.ne.s32.totalorder %s95_s17, %s6500_s3  ;;  %p6505_p10 = scmp.lt.s32.totalorder %s95_s17, %s95_s17 }
  0x74   :  { %p6506_p11 = scmp.lt.s32.totalorder %s6504_s4, %s6500_s3 }
  0x76   :  { %p6507_p12 = por %p6506_p11, %p6505_p10 }
  0x78   :  { %p6508_p13 = pnand %p6507_p12, %p6501_p9 }
  0x7a   :  { %6511 = shalt.err (!%p6508_p13)
}
  0x7b   :  { %97 = dma.hbm_to_vmem [thread:$0]  %s6720_s7, 16, %s95_s17, [#allocation12]  }
  0x7c   :  { %6512 = dma.done.wait [#allocation4], 8192  }
  0x7d   :  { %6513 = vsyncadd [#allocation4], 4294959104 }
  0x7e   :  { %6514 = dma.done.wait [#allocation6], 65600  }
  0x7f   :  { %6515 = vsyncadd [#allocation6], 4294901696 }
  0x80   :  { %6516 = dma.done.wait [#allocation9], 4112  }
  0x81   :  { %6517 = vsyncadd [#allocation9], 4294963184 }
  0x82   :  { %6518 = dma.done.wait [#allocation12], 32  }
  0x83   :  { %6519 = vsyncadd [#allocation12], 4294967264  ;;  %v5534_v1 = vld [vmem:[#allocation5 + $0x4] ss:$16 sps:$4 sm:$0xff]   ;;  %v5536_v2 = vld [vmem:[#allocation5 + $0xc] ss:$16 sps:$4 sm:$0xff]  }
  0x84   :  { %3312 = vmatprep.subr.bf16.mxu0 %v5534_v1  ;;  %v5538_v3 = vld [vmem:[#allocation5] ss:$16 sps:$4 sm:$0xff]   ;;  %v5539_v4 = vld [vmem:[#allocation5 + $0x8] ss:$16 sps:$4 sm:$0xff]   ;;  %3736 = vmatprep.subr.bf16.mxu1 %v5536_v2  ;;  %v5540_v5 = vld [vmem:[#allocation5 + $0x24] ss:$16 sps:$4 sm:$0xff]  }
  0x85   :  { %3313 = vmatpush1.bf16.msra.mxu0 %v5538_v3  ;;  %3737 = vmatpush1.bf16.msra.mxu1 %v5539_v4  ;;  %v5542_v6 = vld [vmem:[#allocation5 + $0x2c] ss:$16 sps:$4 sm:$0xff]   ;;  %v5544_v7 = vld [vmem:[#allocation5 + $0x20] ss:$16 sps:$4 sm:$0xff]   ;;  %v5545_v8 = vld [vmem:[#allocation5 + $0x28] ss:$16 sps:$4 sm:$0xff]  }
  0x86   :  { %3314 = vmatprep.subr.bf16.mxu0 %v5540_v5  ;;  %3738 = vmatprep.subr.bf16.mxu1 %v5542_v6  ;;  %v5546_v9 = vld [vmem:[#allocation5 + $0x44] ss:$16 sps:$4 sm:$0xff]   ;;  %v5548_v10 = vld [vmem:[#allocation5 + $0x4c] ss:$16 sps:$4 sm:$0xff]   ;;  %v5550_v11 = vld [vmem:[#allocation5 + $0x40] ss:$16 sps:$4 sm:$0xff]  }
  0x87   :  { %v5551_v12 = vld [vmem:[#allocation5 + $0x48] ss:$16 sps:$4 sm:$0xff]   ;;  %v5552_v13 = vld [vmem:[#allocation5 + $0x64] ss:$16 sps:$4 sm:$0xff]   ;;  %v5554_v14 = vld [vmem:[#allocation5 + $0x6c] ss:$16 sps:$4 sm:$0xff]  }
  0x88   :  { %v5556_v15 = vld [vmem:[#allocation5 + $0x60] ss:$16 sps:$4 sm:$0xff]   ;;  %v5557_v16 = vld [vmem:[#allocation5 + $0x68] ss:$16 sps:$4 sm:$0xff]   ;;  %v5558_v17 = vld [vmem:[#allocation5 + $0x84] ss:$16 sps:$4 sm:$0xff]  }
  0x89   :  { %3315 = vmatpush1.bf16.msra.mxu0 %v5544_v7  ;;  %3739 = vmatpush1.bf16.msra.mxu1 %v5545_v8  ;;  %v5560_v18 = vld [vmem:[#allocation5 + $0x8c] ss:$16 sps:$4 sm:$0xff]   ;;  %v5562_v19 = vld [vmem:[#allocation5 + $0x80] ss:$16 sps:$4 sm:$0xff]   ;;  %v5563_v20 = vld [vmem:[#allocation5 + $0x88] ss:$16 sps:$4 sm:$0xff]  }
  0x8a   :  { %3316 = vmatprep.subr.bf16.mxu0 %v5546_v9  ;;  %3740 = vmatprep.subr.bf16.mxu1 %v5548_v10  ;;  %v5564_v21 = vld [vmem:[#allocation5 + $0xa4] ss:$16 sps:$4 sm:$0xff]   ;;  %v5566_v22 = vld [vmem:[#allocation5 + $0xac] ss:$16 sps:$4 sm:$0xff]   ;;  %v5568_v23 = vld [vmem:[#allocation5 + $0xa0] ss:$16 sps:$4 sm:$0xff]  }
  0x8b   :  { %v5569_v24 = vld [vmem:[#allocation5 + $0xa8] ss:$16 sps:$4 sm:$0xff]   ;;  %v5570_v25 = vld [vmem:[#allocation5 + $0xc4] ss:$16 sps:$4 sm:$0xff]   ;;  %v5572_v26 = vld [vmem:[#allocation5 + $0xcc] ss:$16 sps:$4 sm:$0xff]  }
  0x8c   :  { %v5574_v27 = vld [vmem:[#allocation5 + $0xc0] ss:$16 sps:$4 sm:$0xff]   ;;  %v5575_v28 = vld [vmem:[#allocation5 + $0xc8] ss:$16 sps:$4 sm:$0xff]   ;;  %v5576_v29 = vld [vmem:[#allocation5 + $0xe4] ss:$16 sps:$4 sm:$0xff]  }
  0x8d   :  { %3317 = vmatpush1.bf16.msra.mxu0 %v5550_v11  ;;  %3741 = vmatpush1.bf16.msra.mxu1 %v5551_v12  ;;  %v5578_v30 = vld [vmem:[#allocation5 + $0xec] ss:$16 sps:$4 sm:$0xff]   ;;  %v5580_v31 = vld [vmem:[#allocation5 + $0xe0] ss:$16 sps:$4 sm:$0xff]   ;;  %v5581_v32 = vld [vmem:[#allocation5 + $0xe8] ss:$16 sps:$4 sm:$0xff]  }
  0x8e   :  { %3318 = vmatprep.subr.bf16.mxu0 %v5552_v13  ;;  %3742 = vmatprep.subr.bf16.mxu1 %v5554_v14  ;;  %v5582_v33 = vld [vmem:[#allocation5 + $0x104] ss:$16 sps:$4 sm:$0xff]   ;;  %v5584_v34 = vld [vmem:[#allocation5 + $0x10c] ss:$16 sps:$4 sm:$0xff]   ;;  %v5586_v35 = vld [vmem:[#allocation5 + $0x100] ss:$16 sps:$4 sm:$0xff]  }
  0x8f   :  { %v5587_v36 = vld [vmem:[#allocation5 + $0x108] ss:$16 sps:$4 sm:$0xff]   ;;  %v5588_v37 = vld [vmem:[#allocation5 + $0x124] ss:$16 sps:$4 sm:$0xff]   ;;  %v5590_v38 = vld [vmem:[#allocation5 + $0x12c] ss:$16 sps:$4 sm:$0xff]  }
  0x90   :  { %v5592_v39 = vld [vmem:[#allocation5 + $0x120] ss:$16 sps:$4 sm:$0xff]   ;;  %v5593_v40 = vld [vmem:[#allocation5 + $0x128] ss:$16 sps:$4 sm:$0xff]   ;;  %v5594_v41 = vld [vmem:[#allocation5 + $0x144] ss:$16 sps:$4 sm:$0xff]  }
  0x91   :  { %3319 = vmatpush1.bf16.msra.mxu0 %v5556_v15  ;;  %3743 = vmatpush1.bf16.msra.mxu1 %v5557_v16  ;;  %v5596_v42 = vld [vmem:[#allocation5 + $0x14c] ss:$16 sps:$4 sm:$0xff]   ;;  %v5598_v43 = vld [vmem:[#allocation5 + $0x140] ss:$16 sps:$4 sm:$0xff]   ;;  %v5599_v44 = vld [vmem:[#allocation5 + $0x148] ss:$16 sps:$4 sm:$0xff]  }
  0x92   :  { %3320 = vmatprep.subr.bf16.mxu0 %v5558_v17  ;;  %3744 = vmatprep.subr.bf16.mxu1 %v5560_v18  ;;  %v5600_v45 = vld [vmem:[#allocation5 + $0x164] ss:$16 sps:$4 sm:$0xff]   ;;  %v5602_v46 = vld [vmem:[#allocation5 + $0x16c] ss:$16 sps:$4 sm:$0xff]   ;;  %v5604_v49 = vld [vmem:[#allocation5 + $0x160] ss:$16 sps:$4 sm:$0xff]  }
  0x93   :  { %v123_v47 = vld [vmem:[#allocation3 + $0x8] sm:$0xff]  ;;  %v5606_v52 = vld [vmem:[#allocation5 + $0x184] ss:$16 sps:$4 sm:$0xff]   ;;  %v5610_v54 = vld [vmem:[#allocation5 + $0x180] ss:$16 sps:$4 sm:$0xff]   ;;  %vm4686_vm0 = vcmask 523264  }
  0x94   :  { %v139_v48 = vld [vmem:[#allocation3 + $0x88] sm:$0xff]  ;;  %v5612_v56 = vld [vmem:[#allocation5 + $0x1a4] ss:$16 sps:$4 sm:$0xff]   ;;  %v5616_v58 = vld [vmem:[#allocation5 + $0x1a0] ss:$16 sps:$4 sm:$0xff]   ;;  %vm4734_vm1 = vcmask 7168  }
  0x95   :  { %3321 = vmatpush1.bf16.msra.mxu0 %v5562_v19  ;;  %3745 = vmatpush1.bf16.msra.mxu1 %v5563_v20  ;;  %v5605_v50 = vld [vmem:[#allocation5 + $0x168] ss:$16 sps:$4 sm:$0xff]   ;;  %v187_v51 = vpack.c.bf16 %v139_v48, %v123_v47  ;;  %v5608_v53 = vld [vmem:[#allocation5 + $0x18c] ss:$16 sps:$4 sm:$0xff]   ;;  %v5618_v60 = vld [vmem:[#allocation5 + $0x1c4] ss:$16 sps:$4 sm:$0xff]  }
  0x96   :  { %3322 = vmatprep.subr.bf16.mxu0 %v5564_v21  ;;  %3746 = vmatprep.subr.bf16.mxu1 %v5566_v22  ;;  %v5611_v55 = vld [vmem:[#allocation5 + $0x188] ss:$16 sps:$4 sm:$0xff]   ;;  %v5614_v57 = vld [vmem:[#allocation5 + $0x1ac] ss:$16 sps:$4 sm:$0xff]   ;;  %v5622_v62 = vld [vmem:[#allocation5 + $0x1c0] ss:$16 sps:$4 sm:$0xff]  }
  0x97   :  { %3344 = vmatprep.mubr.bf16.mxu0 %v187_v51  ;;  %3768 = vmatprep.mubr.bf16.mxu1 %v187_v51  ;;  %v5617_v59 = vld [vmem:[#allocation5 + $0x1a8] ss:$16 sps:$4 sm:$0xff]   ;;  %v5620_v61 = vld [vmem:[#allocation5 + $0x1cc] ss:$16 sps:$4 sm:$0xff]   ;;  %v5624_v0 = vld [vmem:[#allocation5 + $0x1e4] ss:$16 sps:$4 sm:$0xff]  }
  0x98   :  { %v5623_v63 = vld [vmem:[#allocation5 + $0x1c8] ss:$16 sps:$4 sm:$0xff]   ;;  %v5626_v1 = vld [vmem:[#allocation5 + $0x1ec] ss:$16 sps:$4 sm:$0xff]   ;;  %v5628_v2 = vld [vmem:[#allocation5 + $0x1e0] ss:$16 sps:$4 sm:$0xff]  }
  0x99   :  { %3323 = vmatpush1.bf16.msra.mxu0 %v5568_v23  ;;  %3747 = vmatpush1.bf16.msra.mxu1 %v5569_v24  ;;  %v5629_v3 = vld [vmem:[#allocation5 + $0x1e8] ss:$16 sps:$4 sm:$0xff]   ;;  %v5632_v4 = vld [vmem:[#allocation5 + $0x204] ss:$16 sps:$4 sm:$0xff]   ;;  %v5635_v7 = vld [vmem:[#allocation5 + $0x20c] ss:$16 sps:$4 sm:$0xff]  }
  0x9a   :  { %3324 = vmatprep.subr.bf16.mxu0 %v5570_v25  ;;  %3748 = vmatprep.subr.bf16.mxu1 %v5572_v26  ;;  %v122_v5 = vld [vmem:[#allocation3] sm:$0xff]  ;;  %v5633_v9 = vld [vmem:[#allocation5 + $0x208] ss:$16 sps:$4 sm:$0xff]   ;;  %v5641_v12 = vld [vmem:[#allocation5 + $0x22c] ss:$16 sps:$4 sm:$0xff]  }
  0x9b   :  { %v138_v6 = vld [vmem:[#allocation3 + $0x80] sm:$0xff]  ;;  %v5639_v14 = vld [vmem:[#allocation5 + $0x228] ss:$16 sps:$4 sm:$0xff]   ;;  %v5647_v16 = vld [vmem:[#allocation5 + $0x24c] ss:$16 sps:$4 sm:$0xff]  }
  0x9c   :  { %v5630_v8 = vld [vmem:[#allocation5 + $0x200] ss:$16 sps:$4 sm:$0xff]   ;;  %v186_v10 = vpack.c.bf16 %v138_v6, %v122_v5  ;;  %v5638_v11 = vld [vmem:[#allocation5 + $0x224] ss:$16 sps:$4 sm:$0xff]   ;;  %v5645_v18 = vld [vmem:[#allocation5 + $0x248] ss:$16 sps:$4 sm:$0xff]  }
  0x9d   :  { %3325 = vmatpush1.bf16.msra.mxu0 %v5574_v27  ;;  %3749 = vmatpush1.bf16.msra.mxu1 %v5575_v28  ;;  %v5636_v13 = vld [vmem:[#allocation5 + $0x220] ss:$16 sps:$4 sm:$0xff]   ;;  %v5644_v15 = vld [vmem:[#allocation5 + $0x244] ss:$16 sps:$4 sm:$0xff]   ;;  %v5653_v20 = vld [vmem:[#allocation5 + $0x26c] ss:$16 sps:$4 sm:$0xff]  }
  0x9e   :  { %3326 = vmatprep.subr.bf16.mxu0 %v5576_v29  ;;  %3750 = vmatprep.subr.bf16.mxu1 %v5578_v30  ;;  %v5642_v17 = vld [vmem:[#allocation5 + $0x240] ss:$16 sps:$4 sm:$0xff]   ;;  %v5650_v19 = vld [vmem:[#allocation5 + $0x264] ss:$16 sps:$4 sm:$0xff]   ;;  %v5651_v22 = vld [vmem:[#allocation5 + $0x268] ss:$16 sps:$4 sm:$0xff]  }
  0x9f   :  { %v5648_v21 = vld [vmem:[#allocation5 + $0x260] ss:$16 sps:$4 sm:$0xff]   ;;  %v5656_v23 = vld [vmem:[#allocation5 + $0x284] ss:$16 sps:$4 sm:$0xff]   ;;  %v5659_v24 = vld [vmem:[#allocation5 + $0x28c] ss:$16 sps:$4 sm:$0xff]  }
  0xa0   :  { %v5654_v25 = vld [vmem:[#allocation5 + $0x280] ss:$16 sps:$4 sm:$0xff]   ;;  %v5657_v26 = vld [vmem:[#allocation5 + $0x288] ss:$16 sps:$4 sm:$0xff]   ;;  %v5662_v27 = vld [vmem:[#allocation5 + $0x2a4] ss:$16 sps:$4 sm:$0xff]  }
  0xa1   :  { %3327 = vmatpush1.bf16.msra.mxu0 %v5580_v31  ;;  %3751 = vmatpush1.bf16.msra.mxu1 %v5581_v32  ;;  %v5665_v28 = vld [vmem:[#allocation5 + $0x2ac] ss:$16 sps:$4 sm:$0xff]   ;;  %v5660_v31 = vld [vmem:[#allocation5 + $0x2a0] ss:$16 sps:$4 sm:$0xff]   ;;  %v5675_v47 = vld [vmem:[#allocation5 + $0x2e8] ss:$16 sps:$4 sm:$0xff]  }
  0xa2   :  { %3328 = vmatprep.subr.bf16.mxu0 %v5582_v33  ;;  %3752 = vmatprep.subr.bf16.mxu1 %v5584_v34  ;;  %v155_v29 = vld [vmem:[#allocation3 + $0x108] sm:$0xff]  ;;  %v5668_v34 = vld [vmem:[#allocation5 + $0x2c4] ss:$16 sps:$4 sm:$0xff]   ;;  %v5708_v6 = vld [vmem:[#allocation5 + $0x3a0] ss:$16 sps:$4 sm:$0xff]  }
  0xa3   :  { %v171_v30 = vld [vmem:[#allocation3 + $0x188] sm:$0xff]  ;;  %v5680_v48 = vld [vmem:[#allocation5 + $0x304] ss:$16 sps:$4 sm:$0xff]  }
  0xa4   :  { %v203_v32 = vpack.c.bf16 %v171_v30, %v155_v29  ;;  %v5663_v33 = vld [vmem:[#allocation5 + $0x2a8] ss:$16 sps:$4 sm:$0xff]   ;;  %v5713_v5 = vld [vmem:[#allocation5 + $0x3ac] ss:$16 sps:$4 sm:$0xff]   ;;  %v156_v30 = vld [vmem:[#allocation3 + $0x110] sm:$0xff] }
  0xa5   :  { %3329 = vmatpush1.bf16.msra.mxu0 %v5586_v35  ;;  %3753 = vmatpush1.bf16.msra.mxu1 %v5587_v36  ;;  %v5671_v35 = vld [vmem:[#allocation5 + $0x2cc] ss:$16 sps:$4 sm:$0xff]   ;;  %v154_v36 = vld [vmem:[#allocation3 + $0x100] sm:$0xff]  ;;  %v5681_v51 = vld [vmem:[#allocation5 + $0x308] ss:$16 sps:$4 sm:$0xff]  }
  0xa6   :  { %3330 = vmatprep.subr.bf16.mxu0 %v5588_v37  ;;  %3754 = vmatprep.subr.bf16.mxu1 %v5590_v38  ;;  %v170_v37 = vld [vmem:[#allocation3 + $0x180] sm:$0xff]  ;;  %v5735_v29 = vld [vmem:[#allocation5 + $0x428] ss:$16 sps:$4 sm:$0xff]  }
  0xa7   :  { %v202_v38 = vpack.c.bf16 %v170_v37, %v154_v36  ;;  %v143_v36 = vld [vmem:[#allocation3 + $0xa8] sm:$0xff]  ;;  %v5738_v37 = vld [vmem:[#allocation5 + $0x440] ss:$16 sps:$4 sm:$0xff]  }
  0xa9   :  { %3331 = vmatpush1.bf16.msra.mxu0 %v5592_v39  ;;  %3755 = vmatpush1.bf16.msra.mxu1 %v5593_v40  ;;  %v5666_v39 = vld [vmem:[#allocation5 + $0x2c0] ss:$16 sps:$4 sm:$0xff]   ;;  %v5669_v40 = vld [vmem:[#allocation5 + $0x2c8] ss:$16 sps:$4 sm:$0xff]  }
  0xaa   :  { %3332 = vmatprep.subr.bf16.mxu0 %v5594_v41  ;;  %3756 = vmatprep.subr.bf16.mxu1 %v5596_v42  ;;  %v125_v41 = vld [vmem:[#allocation3 + $0x18] sm:$0xff] }
  0xab   :  { %v141_v42 = vld [vmem:[#allocation3 + $0x98] sm:$0xff] }
  0xad   :  { %3333 = vmatpush1.bf16.msra.mxu0 %v5598_v43  ;;  %3757 = vmatpush1.bf16.msra.mxu1 %v5599_v44  ;;  %v5674_v43 = vld [vmem:[#allocation5 + $0x2e4] ss:$16 sps:$4 sm:$0xff]   ;;  %v5677_v44 = vld [vmem:[#allocation5 + $0x2ec] ss:$16 sps:$4 sm:$0xff]  }
  0xae   :  { %3334 = vmatprep.subr.bf16.mxu0 %v5600_v45  ;;  %3758 = vmatprep.subr.bf16.mxu1 %v5602_v46  ;;  %v189_v45 = vpack.c.bf16 %v141_v42, %v125_v41  ;;  %v5672_v46 = vld [vmem:[#allocation5 + $0x2e0] ss:$16 sps:$4 sm:$0xff]  }
  0xaf   :  { %v5744_v42 = vld [vmem:[#allocation5 + $0x460] ss:$16 sps:$4 sm:$0xff]  }
  0xb1   :  { %3335 = vmatpush1.bf16.msra.mxu0 %v5604_v49  ;;  %3759 = vmatpush1.bf16.msra.mxu1 %v5605_v50  ;;  %v5683_v49 = vld [vmem:[#allocation5 + $0x30c] ss:$16 sps:$4 sm:$0xff]   ;;  %v5678_v50 = vld [vmem:[#allocation5 + $0x300] ss:$16 sps:$4 sm:$0xff]  }
  0xb2   :  { %3336 = vmatprep.subr.bf16.mxu0 %v5606_v52  ;;  %3760 = vmatprep.subr.bf16.mxu1 %v5608_v53  ;;  %v5686_v52 = vld [vmem:[#allocation5 + $0x324] ss:$16 sps:$4 sm:$0xff]   ;;  %v5689_v53 = vld [vmem:[#allocation5 + $0x32c] ss:$16 sps:$4 sm:$0xff]  }
  0xb5   :  { %3337 = vmatpush1.bf16.msra.mxu0 %v5610_v54  ;;  %3761 = vmatpush1.bf16.msra.mxu1 %v5611_v55  ;;  %v5684_v54 = vld [vmem:[#allocation5 + $0x320] ss:$16 sps:$4 sm:$0xff]   ;;  %v5687_v55 = vld [vmem:[#allocation5 + $0x328] ss:$16 sps:$4 sm:$0xff]  }
  0xb6   :  { %3338 = vmatprep.subr.bf16.mxu0 %v5612_v56  ;;  %3762 = vmatprep.subr.bf16.mxu1 %v5614_v57  ;;  %v5692_v56 = vld [vmem:[#allocation5 + $0x344] ss:$16 sps:$4 sm:$0xff]   ;;  %v5695_v57 = vld [vmem:[#allocation5 + $0x34c] ss:$16 sps:$4 sm:$0xff]  }
  0xb9   :  { %3339 = vmatpush1.bf16.msra.mxu0 %v5616_v58  ;;  %3763 = vmatpush1.bf16.msra.mxu1 %v5617_v59  ;;  %v5690_v58 = vld [vmem:[#allocation5 + $0x340] ss:$16 sps:$4 sm:$0xff]   ;;  %v5693_v59 = vld [vmem:[#allocation5 + $0x348] ss:$16 sps:$4 sm:$0xff]  }
  0xba   :  { %3340 = vmatprep.subr.bf16.mxu0 %v5618_v60  ;;  %3764 = vmatprep.subr.bf16.mxu1 %v5620_v61  ;;  %v5698_v60 = vld [vmem:[#allocation5 + $0x364] ss:$16 sps:$4 sm:$0xff]   ;;  %v5701_v61 = vld [vmem:[#allocation5 + $0x36c] ss:$16 sps:$4 sm:$0xff]  }
  0xbd   :  { %3341 = vmatpush1.bf16.msra.mxu0 %v5622_v62  ;;  %3765 = vmatpush1.bf16.msra.mxu1 %v5623_v63  ;;  %v5696_v62 = vld [vmem:[#allocation5 + $0x360] ss:$16 sps:$4 sm:$0xff]   ;;  %v5699_v63 = vld [vmem:[#allocation5 + $0x368] ss:$16 sps:$4 sm:$0xff]  }
  0xbe   :  { %3342 = vmatprep.subr.bf16.mxu0 %v5624_v0  ;;  %3766 = vmatprep.subr.bf16.mxu1 %v5626_v1  ;;  %v5704_v0 = vld [vmem:[#allocation5 + $0x384] ss:$16 sps:$4 sm:$0xff]   ;;  %v5707_v1 = vld [vmem:[#allocation5 + $0x38c] ss:$16 sps:$4 sm:$0xff]  }
  0xc1   :  { %3343 = vmatpush1.bf16.msra.mxu0 %v5628_v2  ;;  %3767 = vmatpush1.bf16.msra.mxu1 %v5629_v3  ;;  %v5702_v2 = vld [vmem:[#allocation5 + $0x380] ss:$16 sps:$4 sm:$0xff]   ;;  %v5705_v3 = vld [vmem:[#allocation5 + $0x388] ss:$16 sps:$4 sm:$0xff]  }
  0xc2   :  { %3365 = vmatprep.subr.bf16.mxu0 %v5632_v4  ;;  %3789 = vmatprep.subr.bf16.mxu1 %v5635_v7  ;;  %v5710_v4 = vld [vmem:[#allocation5 + $0x3a4] ss:$16 sps:$4 sm:$0xff]   ;;  %v5711_v7 = vld [vmem:[#allocation5 + $0x3a8] ss:$16 sps:$4 sm:$0xff]  }
  0xc4   :  { %3345 = vmatmul.mubr.bf16.vlgmr.msra.gmra.mrb[0].mxu0 %v186_v10  ;;  %3769 = vmatmul.mubr.bf16.vlgmr.msra.gmra.mrb[0].mxu1 %v186_v10  ;;  %v5714_v10 = vld [vmem:[#allocation5 + $0x3c0] ss:$16 sps:$4 sm:$0xff]  }
  0xc5   :  { %3366 = vmatpush1.bf16.msra.mxu0 %v5630_v8  ;;  %3790 = vmatpush1.bf16.msra.mxu1 %v5633_v9  ;;  %v5716_v8 = vld [vmem:[#allocation5 + $0x3c4] ss:$16 sps:$4 sm:$0xff]   ;;  %v5719_v9 = vld [vmem:[#allocation5 + $0x3cc] ss:$16 sps:$4 sm:$0xff]  }
  0xc6   :  { %3367 = vmatprep.subr.bf16.mxu0 %v5638_v11  ;;  %3791 = vmatprep.subr.bf16.mxu1 %v5641_v12  ;;  %v5717_v11 = vld [vmem:[#allocation5 + $0x3c8] ss:$16 sps:$4 sm:$0xff]   ;;  %v5722_v12 = vld [vmem:[#allocation5 + $0x3e4] ss:$16 sps:$4 sm:$0xff]  }
  0xc7   :  { %3354 = vmatprep.mubr.bf16.mxu0 %v203_v32  ;;  %3778 = vmatprep.mubr.bf16.mxu1 %v203_v32  ;;  %v5740_v32 = vld [vmem:[#allocation5 + $0x444] ss:$16 sps:$4 sm:$0xff]  }
  0xc9   :  { %3368 = vmatpush1.bf16.msra.mxu0 %v5636_v13  ;;  %3792 = vmatpush1.bf16.msra.mxu1 %v5639_v14  ;;  %v5725_v13 = vld [vmem:[#allocation5 + $0x3ec] ss:$16 sps:$4 sm:$0xff]   ;;  %v5720_v14 = vld [vmem:[#allocation5 + $0x3e0] ss:$16 sps:$4 sm:$0xff]  }
  0xca   :  { %3369 = vmatprep.subr.bf16.mxu0 %v5644_v15  ;;  %3793 = vmatprep.subr.bf16.mxu1 %v5647_v16  ;;  %v5723_v15 = vld [vmem:[#allocation5 + $0x3e8] ss:$16 sps:$4 sm:$0xff]   ;;  %v5728_v16 = vld [vmem:[#allocation5 + $0x404] ss:$16 sps:$4 sm:$0xff]  }
  0xcc   :  { %3355 = vmatmul.mubr.bf16.gmra.mrb[4].mxu0 %v202_v38  ;;  %3779 = vmatmul.mubr.bf16.gmra.mrb[4].mxu1 %v202_v38  ;;  %v5741_v38 = vld [vmem:[#allocation5 + $0x448] ss:$16 sps:$4 sm:$0xff]  }
  0xcd   :  { %3370 = vmatpush1.bf16.msra.mxu0 %v5642_v17  ;;  %3794 = vmatpush1.bf16.msra.mxu1 %v5645_v18  ;;  %v124_v17 = vld [vmem:[#allocation3 + $0x10] sm:$0xff] }
  0xce   :  { %3371 = vmatprep.subr.bf16.mxu0 %v5650_v19  ;;  %3795 = vmatprep.subr.bf16.mxu1 %v5653_v20  ;;  %v140_v18 = vld [vmem:[#allocation3 + $0x90] sm:$0xff]  ;;  %v5731_v19 = vld [vmem:[#allocation5 + $0x40c] ss:$16 sps:$4 sm:$0xff]  }
  0xcf   :  { %3397 = vmatprep.mubr.bf16.mxu0 %v189_v45  ;;  %3821 = vmatprep.mubr.bf16.mxu1 %v189_v45  ;;  %v157_v20 = vld [vmem:[#allocation3 + $0x118] sm:$0xff] }
  0xd0   :  { %v5755_v45 = vld [vmem:[#allocation5 + $0x48c] ss:$16 sps:$4 sm:$0xff]  }
  0xd1   :  { %3372 = vmatpush1.bf16.msra.mxu0 %v5648_v21  ;;  %3796 = vmatpush1.bf16.msra.mxu1 %v5651_v22  ;;  %v188_v21 = vpack.c.bf16 %v140_v18, %v124_v17  ;;  %v173_v22 = vld [vmem:[#allocation3 + $0x198] sm:$0xff]  ;;  %v5804_v18 = vld [vmem:[#allocation5 + $0x5a0] ss:$16 sps:$4 sm:$0xff]  }
  0xd2   :  { %3373 = vmatprep.subr.bf16.mxu0 %v5656_v23  ;;  %3797 = vmatprep.subr.bf16.mxu1 %v5659_v24  ;;  %v5726_v23 = vld [vmem:[#allocation5 + $0x400] ss:$16 sps:$4 sm:$0xff]   ;;  %v5729_v24 = vld [vmem:[#allocation5 + $0x408] ss:$16 sps:$4 sm:$0xff]   ;;  %v5809_v17 = vld [vmem:[#allocation5 + $0x5ac] ss:$16 sps:$4 sm:$0xff]  }
  0xd5   :  { %3374 = vmatpush1.bf16.msra.mxu0 %v5654_v25  ;;  %3798 = vmatpush1.bf16.msra.mxu1 %v5657_v26  ;;  %v5734_v25 = vld [vmem:[#allocation5 + $0x424] ss:$16 sps:$4 sm:$0xff]   ;;  %v5737_v26 = vld [vmem:[#allocation5 + $0x42c] ss:$16 sps:$4 sm:$0xff]  }
  0xd6   :  { %3375 = vmatprep.subr.bf16.mxu0 %v5662_v27  ;;  %3799 = vmatprep.subr.bf16.mxu1 %v5665_v28  ;;  %v5732_v27 = vld [vmem:[#allocation5 + $0x420] ss:$16 sps:$4 sm:$0xff]   ;;  %v205_v28 = vpack.c.bf16 %v173_v22, %v157_v20  ;;  %v5812_v20 = vld [vmem:[#allocation5 + $0x5c4] ss:$16 sps:$4 sm:$0xff]  }
  0xd7   :  { %v5810_v22 = vld [vmem:[#allocation5 + $0x5c0] ss:$16 sps:$4 sm:$0xff]  }
  0xd9   :  { %3376 = vmatpush1.bf16.msra.mxu0 %v5660_v31  ;;  %3800 = vmatpush1.bf16.msra.mxu1 %v5663_v33  ;;  %v172_v31 = vld [vmem:[#allocation3 + $0x190] sm:$0xff]  ;;  %v5743_v33 = vld [vmem:[#allocation5 + $0x44c] ss:$16 sps:$4 sm:$0xff]  }
  0xda   :  { %3377 = vmatprep.subr.bf16.mxu0 %v5668_v34  ;;  %3801 = vmatprep.subr.bf16.mxu1 %v5671_v35  ;;  %v127_v34 = vld [vmem:[#allocation3 + $0x28] sm:$0xff]  ;;  %v204_v35 = vpack.c.bf16 %v172_v31, %v156_v30  ;;  %v142_v30 = vld [vmem:[#allocation3 + $0xa0] sm:$0xff] }
  0xdb   :  { %v191_v41 = vpack.c.bf16 %v143_v36, %v127_v34  ;;  %v5827_v31 = vld [vmem:[#allocation5 + $0x60c] ss:$16 sps:$4 sm:$0xff]  }
  0xdc   :  { %v175_v36 = vld [vmem:[#allocation3 + $0x1a8] sm:$0xff] }
  0xdd   :  { %3378 = vmatpush1.bf16.msra.mxu0 %v5666_v39  ;;  %3802 = vmatpush1.bf16.msra.mxu1 %v5669_v40  ;;  %v5746_v39 = vld [vmem:[#allocation5 + $0x464] ss:$16 sps:$4 sm:$0xff]   ;;  %v5749_v40 = vld [vmem:[#allocation5 + $0x46c] ss:$16 sps:$4 sm:$0xff]  }
  0xde   :  { %3379 = vmatprep.subr.bf16.mxu0 %v5674_v43  ;;  %3803 = vmatprep.subr.bf16.mxu1 %v5677_v44  ;;  %v5747_v43 = vld [vmem:[#allocation5 + $0x468] ss:$16 sps:$4 sm:$0xff]   ;;  %v5752_v44 = vld [vmem:[#allocation5 + $0x484] ss:$16 sps:$4 sm:$0xff]  }
  0xe1   :  { %3380 = vmatpush1.bf16.msra.mxu0 %v5672_v46  ;;  %3804 = vmatpush1.bf16.msra.mxu1 %v5675_v47  ;;  %v5750_v46 = vld [vmem:[#allocation5 + $0x480] ss:$16 sps:$4 sm:$0xff]   ;;  %v5753_v47 = vld [vmem:[#allocation5 + $0x488] ss:$16 sps:$4 sm:$0xff]  }
  0xe2   :  { %3381 = vmatprep.subr.bf16.mxu0 %v5680_v48  ;;  %3805 = vmatprep.subr.bf16.mxu1 %v5683_v49  ;;  %v5758_v48 = vld [vmem:[#allocation5 + $0x4a4] ss:$16 sps:$4 sm:$0xff]   ;;  %v5761_v49 = vld [vmem:[#allocation5 + $0x4ac] ss:$16 sps:$4 sm:$0xff]  }
  0xe5   :  { %3382 = vmatpush1.bf16.msra.mxu0 %v5678_v50  ;;  %3806 = vmatpush1.bf16.msra.mxu1 %v5681_v51  ;;  %v5756_v50 = vld [vmem:[#allocation5 + $0x4a0] ss:$16 sps:$4 sm:$0xff]   ;;  %v5759_v51 = vld [vmem:[#allocation5 + $0x4a8] ss:$16 sps:$4 sm:$0xff]  }
  0xe6   :  { %3383 = vmatprep.subr.bf16.mxu0 %v5686_v52  ;;  %3807 = vmatprep.subr.bf16.mxu1 %v5689_v53  ;;  %v5764_v52 = vld [vmem:[#allocation5 + $0x4c4] ss:$16 sps:$4 sm:$0xff]   ;;  %v5767_v53 = vld [vmem:[#allocation5 + $0x4cc] ss:$16 sps:$4 sm:$0xff]  }
  0xe9   :  { %3384 = vmatpush1.bf16.msra.mxu0 %v5684_v54  ;;  %3808 = vmatpush1.bf16.msra.mxu1 %v5687_v55  ;;  %v5762_v54 = vld [vmem:[#allocation5 + $0x4c0] ss:$16 sps:$4 sm:$0xff]   ;;  %v5765_v55 = vld [vmem:[#allocation5 + $0x4c8] ss:$16 sps:$4 sm:$0xff]  }
  0xea   :  { %3385 = vmatprep.subr.bf16.mxu0 %v5692_v56  ;;  %3809 = vmatprep.subr.bf16.mxu1 %v5695_v57  ;;  %v5770_v56 = vld [vmem:[#allocation5 + $0x4e4] ss:$16 sps:$4 sm:$0xff]   ;;  %v5773_v57 = vld [vmem:[#allocation5 + $0x4ec] ss:$16 sps:$4 sm:$0xff]  }
  0xed   :  { %3386 = vmatpush1.bf16.msra.mxu0 %v5690_v58  ;;  %3810 = vmatpush1.bf16.msra.mxu1 %v5693_v59  ;;  %v5768_v58 = vld [vmem:[#allocation5 + $0x4e0] ss:$16 sps:$4 sm:$0xff]   ;;  %v5771_v59 = vld [vmem:[#allocation5 + $0x4e8] ss:$16 sps:$4 sm:$0xff]  }
  0xee   :  { %3387 = vmatprep.subr.bf16.mxu0 %v5698_v60  ;;  %3811 = vmatprep.subr.bf16.mxu1 %v5701_v61  ;;  %v5776_v60 = vld [vmem:[#allocation5 + $0x504] ss:$16 sps:$4 sm:$0xff]   ;;  %v5779_v61 = vld [vmem:[#allocation5 + $0x50c] ss:$16 sps:$4 sm:$0xff]  }
  0xf1   :  { %3388 = vmatpush1.bf16.msra.mxu0 %v5696_v62  ;;  %3812 = vmatpush1.bf16.msra.mxu1 %v5699_v63  ;;  %v5774_v62 = vld [vmem:[#allocation5 + $0x500] ss:$16 sps:$4 sm:$0xff]   ;;  %v5777_v63 = vld [vmem:[#allocation5 + $0x508] ss:$16 sps:$4 sm:$0xff]  }
  0xf2   :  { %3389 = vmatprep.subr.bf16.mxu0 %v5704_v0  ;;  %3813 = vmatprep.subr.bf16.mxu1 %v5707_v1  ;;  %v5782_v0 = vld [vmem:[#allocation5 + $0x524] ss:$16 sps:$4 sm:$0xff]   ;;  %v5785_v1 = vld [vmem:[#allocation5 + $0x52c] ss:$16 sps:$4 sm:$0xff]  }
  0xf5   :  { %3390 = vmatpush1.bf16.msra.mxu0 %v5702_v2  ;;  %3814 = vmatpush1.bf16.msra.mxu1 %v5705_v3  ;;  %v5780_v2 = vld [vmem:[#allocation5 + $0x520] ss:$16 sps:$4 sm:$0xff]   ;;  %v5783_v3 = vld [vmem:[#allocation5 + $0x528] ss:$16 sps:$4 sm:$0xff]  }
  0xf6   :  { %3391 = vmatprep.subr.bf16.mxu0 %v5710_v4  ;;  %3815 = vmatprep.subr.bf16.mxu1 %v5713_v5  ;;  %v5788_v4 = vld [vmem:[#allocation5 + $0x544] ss:$16 sps:$4 sm:$0xff]   ;;  %v5791_v5 = vld [vmem:[#allocation5 + $0x54c] ss:$16 sps:$4 sm:$0xff]  }
  0xf9   :  { %3392 = vmatpush1.bf16.msra.mxu0 %v5708_v6  ;;  %3816 = vmatpush1.bf16.msra.mxu1 %v5711_v7  ;;  %v5786_v6 = vld [vmem:[#allocation5 + $0x540] ss:$16 sps:$4 sm:$0xff]   ;;  %v5789_v7 = vld [vmem:[#allocation5 + $0x548] ss:$16 sps:$4 sm:$0xff]  }
  0xfa   :  { %3393 = vmatprep.subr.bf16.mxu0 %v5716_v8  ;;  %3817 = vmatprep.subr.bf16.mxu1 %v5719_v9  ;;  %v5794_v8 = vld [vmem:[#allocation5 + $0x564] ss:$16 sps:$4 sm:$0xff]   ;;  %v5797_v9 = vld [vmem:[#allocation5 + $0x56c] ss:$16 sps:$4 sm:$0xff]  }
  0xfd   :  { %3394 = vmatpush1.bf16.msra.mxu0 %v5714_v10  ;;  %3818 = vmatpush1.bf16.msra.mxu1 %v5717_v11  ;;  %v5792_v10 = vld [vmem:[#allocation5 + $0x560] ss:$16 sps:$4 sm:$0xff]   ;;  %v5795_v11 = vld [vmem:[#allocation5 + $0x568] ss:$16 sps:$4 sm:$0xff]  }
  0xfe   :  { %3395 = vmatprep.subr.bf16.mxu0 %v5722_v12  ;;  %3819 = vmatprep.subr.bf16.mxu1 %v5725_v13  ;;  %v5800_v12 = vld [vmem:[#allocation5 + $0x584] ss:$16 sps:$4 sm:$0xff]   ;;  %v5803_v13 = vld [vmem:[#allocation5 + $0x58c] ss:$16 sps:$4 sm:$0xff]  }
 0x101   :  { %3396 = vmatpush1.bf16.msra.mxu0 %v5720_v14  ;;  %3820 = vmatpush1.bf16.msra.mxu1 %v5723_v15  ;;  %v5798_v14 = vld [vmem:[#allocation5 + $0x580] ss:$16 sps:$4 sm:$0xff]   ;;  %v5801_v15 = vld [vmem:[#allocation5 + $0x588] ss:$16 sps:$4 sm:$0xff]  }
 0x102   :  { %3418 = vmatprep.subr.bf16.mxu0 %v5728_v16  ;;  %3842 = vmatprep.subr.bf16.mxu1 %v5731_v19  ;;  %v5806_v16 = vld [vmem:[#allocation5 + $0x5a4] ss:$16 sps:$4 sm:$0xff]   ;;  %v5807_v19 = vld [vmem:[#allocation5 + $0x5a8] ss:$16 sps:$4 sm:$0xff]  }
 0x104   :  { %3398 = vmatmul.mubr.bf16.vlgmr.msra.gmra.mrb[0].mxu0 %v188_v21  ;;  %3822 = vmatmul.mubr.bf16.vlgmr.msra.gmra.mrb[0].mxu1 %v188_v21  ;;  %v5815_v21 = vld [vmem:[#allocation5 + $0x5cc] ss:$16 sps:$4 sm:$0xff]  }
 0x105   :  { %3419 = vmatpush1.bf16.msra.mxu0 %v5726_v23  ;;  %3843 = vmatpush1.bf16.msra.mxu1 %v5729_v24  ;;  %v5813_v23 = vld [vmem:[#allocation5 + $0x5c8] ss:$16 sps:$4 sm:$0xff]   ;;  %v5818_v24 = vld [vmem:[#allocation5 + $0x5e4] ss:$16 sps:$4 sm:$0xff]  }
 0x106   :  { %3420 = vmatprep.subr.bf16.mxu0 %v5734_v25  ;;  %3844 = vmatprep.subr.bf16.mxu1 %v5737_v26  ;;  %v5821_v25 = vld [vmem:[#allocation5 + $0x5ec] ss:$16 sps:$4 sm:$0xff]   ;;  %v5816_v26 = vld [vmem:[#allocation5 + $0x5e0] ss:$16 sps:$4 sm:$0xff]  }
 0x107   :  { %3407 = vmatprep.mubr.bf16.mxu0 %v205_v28  ;;  %3831 = vmatprep.mubr.bf16.mxu1 %v205_v28  ;;  %v5824_v28 = vld [vmem:[#allocation5 + $0x604] ss:$16 sps:$4 sm:$0xff]  }
 0x109   :  { %3421 = vmatpush1.bf16.msra.mxu0 %v5732_v27  ;;  %3845 = vmatpush1.bf16.msra.mxu1 %v5735_v29  ;;  %v5819_v27 = vld [vmem:[#allocation5 + $0x5e8] ss:$16 sps:$4 sm:$0xff]   ;;  %v126_v29 = vld [vmem:[#allocation3 + $0x20] sm:$0xff] }
 0x10a   :  { %3422 = vmatprep.subr.bf16.mxu0 %v5740_v32  ;;  %3846 = vmatprep.subr.bf16.mxu1 %v5743_v33  ;;  %v5822_v32 = vld [vmem:[#allocation5 + $0x600] ss:$16 sps:$4 sm:$0xff]   ;;  %v5825_v33 = vld [vmem:[#allocation5 + $0x608] ss:$16 sps:$4 sm:$0xff]   ;;  %v190_v34 = vpack.c.bf16 %v142_v30, %v126_v29  ;;  %v5905_v29 = vld [vmem:[#allocation5 + $0x7ac] ss:$16 sps:$4 sm:$0xff]  }
 0x10b   :  { %v5900_v30 = vld [vmem:[#allocation5 + $0x7a0] ss:$16 sps:$4 sm:$0xff]  }
 0x10c   :  { %3408 = vmatmul.mubr.bf16.gmra.mrb[4].mxu0 %v204_v35  ;;  %3832 = vmatmul.mubr.bf16.gmra.mrb[4].mxu1 %v204_v35  ;;  %v159_v35 = vld [vmem:[#allocation3 + $0x128] sm:$0xff] }
 0x10d   :  { %3423 = vmatpush1.bf16.msra.mxu0 %v5738_v37  ;;  %3847 = vmatpush1.bf16.msra.mxu1 %v5741_v38  ;;  %v5830_v37 = vld [vmem:[#allocation5 + $0x624] ss:$16 sps:$4 sm:$0xff]   ;;  %v5833_v38 = vld [vmem:[#allocation5 + $0x62c] ss:$16 sps:$4 sm:$0xff]  }
 0x10e   :  { %3424 = vmatprep.subr.bf16.mxu0 %v5746_v39  ;;  %3848 = vmatprep.subr.bf16.mxu1 %v5749_v40  ;;  %v5828_v39 = vld [vmem:[#allocation5 + $0x620] ss:$16 sps:$4 sm:$0xff]   ;;  %v5831_v40 = vld [vmem:[#allocation5 + $0x628] ss:$16 sps:$4 sm:$0xff]  }
 0x10f   :  { %3450 = vmatprep.mubr.bf16.mxu0 %v191_v41  ;;  %3874 = vmatprep.mubr.bf16.mxu1 %v191_v41  ;;  %v207_v41 = vpack.c.bf16 %v175_v36, %v159_v35  ;;  %v5909_v35 = vld [vmem:[#allocation5 + $0x7c8] ss:$16 sps:$4 sm:$0xff]   ;;  %v5914_v36 = vld [vmem:[#allocation5 + $0x7e4] ss:$16 sps:$4 sm:$0xff]  }
 0x111   :  { %3425 = vmatpush1.bf16.msra.mxu0 %v5744_v42  ;;  %3849 = vmatpush1.bf16.msra.mxu1 %v5747_v43  ;;  %v5836_v42 = vld [vmem:[#allocation5 + $0x644] ss:$16 sps:$4 sm:$0xff]  }
 0x112   :  { %3426 = vmatprep.subr.bf16.mxu0 %v5752_v44  ;;  %3850 = vmatprep.subr.bf16.mxu1 %v5755_v45  ;;  %v158_v43 = vld [vmem:[#allocation3 + $0x120] sm:$0xff]  ;;  %v5839_v45 = vld [vmem:[#allocation5 + $0x64c] ss:$16 sps:$4 sm:$0xff]  }
 0x113   :  { %v174_v44 = vld [vmem:[#allocation3 + $0x1a0] sm:$0xff] }
 0x115   :  { %3427 = vmatpush1.bf16.msra.mxu0 %v5750_v46  ;;  %3851 = vmatpush1.bf16.msra.mxu1 %v5753_v47  ;;  %v5834_v46 = vld [vmem:[#allocation5 + $0x640] ss:$16 sps:$4 sm:$0xff]   ;;  %v5837_v47 = vld [vmem:[#allocation5 + $0x648] ss:$16 sps:$4 sm:$0xff]  }
 0x116   :  { %3428 = vmatprep.subr.bf16.mxu0 %v5758_v48  ;;  %3852 = vmatprep.subr.bf16.mxu1 %v5761_v49  ;;  %v206_v48 = vpack.c.bf16 %v174_v44, %v158_v43  ;;  %v129_v49 = vld [vmem:[#allocation3 + $0x38] sm:$0xff]  ;;  %v5918_v44 = vld [vmem:[#allocation5 + $0x800] ss:$16 sps:$4 sm:$0xff]  }
 0x117   :  { %v5923_v43 = vld [vmem:[#allocation5 + $0x80c] ss:$16 sps:$4 sm:$0xff]  }
 0x119   :  { %3429 = vmatpush1.bf16.msra.mxu0 %v5756_v50  ;;  %3853 = vmatpush1.bf16.msra.mxu1 %v5759_v51  ;;  %v145_v50 = vld [vmem:[#allocation3 + $0xb8] sm:$0xff]  ;;  %v5842_v51 = vld [vmem:[#allocation5 + $0x664] ss:$16 sps:$4 sm:$0xff]  }
 0x11a   :  { %3430 = vmatprep.subr.bf16.mxu0 %v5764_v52  ;;  %3854 = vmatprep.subr.bf16.mxu1 %v5767_v53  ;;  %v5845_v52 = vld [vmem:[#allocation5 + $0x66c] ss:$16 sps:$4 sm:$0xff]   ;;  %v193_v53 = vpack.c.bf16 %v145_v50, %v129_v49  ;;  %v5926_v49 = vld [vmem:[#allocation5 + $0x824] ss:$16 sps:$4 sm:$0xff]  }
 0x11b   :  { %v5929_v50 = vld [vmem:[#allocation5 + $0x82c] ss:$16 sps:$4 sm:$0xff]  }
 0x11d   :  { %3431 = vmatpush1.bf16.msra.mxu0 %v5762_v54  ;;  %3855 = vmatpush1.bf16.msra.mxu1 %v5765_v55  ;;  %v5840_v54 = vld [vmem:[#allocation5 + $0x660] ss:$16 sps:$4 sm:$0xff]   ;;  %v5843_v55 = vld [vmem:[#allocation5 + $0x668] ss:$16 sps:$4 sm:$0xff]  }
 0x11e   :  { %3432 = vmatprep.subr.bf16.mxu0 %v5770_v56  ;;  %3856 = vmatprep.subr.bf16.mxu1 %v5773_v57  ;;  %v5848_v56 = vld [vmem:[#allocation5 + $0x684] ss:$16 sps:$4 sm:$0xff]   ;;  %v5851_v57 = vld [vmem:[#allocation5 + $0x68c] ss:$16 sps:$4 sm:$0xff]  }
 0x121   :  { %3433 = vmatpush1.bf16.msra.mxu0 %v5768_v58  ;;  %3857 = vmatpush1.bf16.msra.mxu1 %v5771_v59  ;;  %v5846_v58 = vld [vmem:[#allocation5 + $0x680] ss:$16 sps:$4 sm:$0xff]   ;;  %v5849_v59 = vld [vmem:[#allocation5 + $0x688] ss:$16 sps:$4 sm:$0xff]  }
 0x122   :  { %3434 = vmatprep.subr.bf16.mxu0 %v5776_v60  ;;  %3858 = vmatprep.subr.bf16.mxu1 %v5779_v61  ;;  %v5854_v60 = vld [vmem:[#allocation5 + $0x6a4] ss:$16 sps:$4 sm:$0xff]   ;;  %v5857_v61 = vld [vmem:[#allocation5 + $0x6ac] ss:$16 sps:$4 sm:$0xff]  }
 0x125   :  { %3435 = vmatpush1.bf16.msra.mxu0 %v5774_v62  ;;  %3859 = vmatpush1.bf16.msra.mxu1 %v5777_v63  ;;  %v5852_v62 = vld [vmem:[#allocation5 + $0x6a0] ss:$16 sps:$4 sm:$0xff]   ;;  %v5855_v63 = vld [vmem:[#allocation5 + $0x6a8] ss:$16 sps:$4 sm:$0xff]  }
 0x126   :  { %3436 = vmatprep.subr.bf16.mxu0 %v5782_v0  ;;  %3860 = vmatprep.subr.bf16.mxu1 %v5785_v1  ;;  %v5860_v0 = vld [vmem:[#allocation5 + $0x6c4] ss:$16 sps:$4 sm:$0xff]   ;;  %v5863_v1 = vld [vmem:[#allocation5 + $0x6cc] ss:$16 sps:$4 sm:$0xff]  }
 0x129   :  { %3437 = vmatpush1.bf16.msra.mxu0 %v5780_v2  ;;  %3861 = vmatpush1.bf16.msra.mxu1 %v5783_v3  ;;  %v5858_v2 = vld [vmem:[#allocation5 + $0x6c0] ss:$16 sps:$4 sm:$0xff]   ;;  %v5861_v3 = vld [vmem:[#allocation5 + $0x6c8] ss:$16 sps:$4 sm:$0xff]  }
 0x12a   :  { %3438 = vmatprep.subr.bf16.mxu0 %v5788_v4  ;;  %3862 = vmatprep.subr.bf16.mxu1 %v5791_v5  ;;  %v5866_v4 = vld [vmem:[#allocation5 + $0x6e4] ss:$16 sps:$4 sm:$0xff]   ;;  %v5869_v5 = vld [vmem:[#allocation5 + $0x6ec] ss:$16 sps:$4 sm:$0xff]  }
 0x12d   :  { %3439 = vmatpush1.bf16.msra.mxu0 %v5786_v6  ;;  %3863 = vmatpush1.bf16.msra.mxu1 %v5789_v7  ;;  %v5864_v6 = vld [vmem:[#allocation5 + $0x6e0] ss:$16 sps:$4 sm:$0xff]   ;;  %v5867_v7 = vld [vmem:[#allocation5 + $0x6e8] ss:$16 sps:$4 sm:$0xff]  }
 0x12e   :  { %3440 = vmatprep.subr.bf16.mxu0 %v5794_v8  ;;  %3864 = vmatprep.subr.bf16.mxu1 %v5797_v9  ;;  %v5872_v8 = vld [vmem:[#allocation5 + $0x704] ss:$16 sps:$4 sm:$0xff]   ;;  %v5875_v9 = vld [vmem:[#allocation5 + $0x70c] ss:$16 sps:$4 sm:$0xff]  }
 0x131   :  { %3441 = vmatpush1.bf16.msra.mxu0 %v5792_v10  ;;  %3865 = vmatpush1.bf16.msra.mxu1 %v5795_v11  ;;  %v5870_v10 = vld [vmem:[#allocation5 + $0x700] ss:$16 sps:$4 sm:$0xff]   ;;  %v5873_v11 = vld [vmem:[#allocation5 + $0x708] ss:$16 sps:$4 sm:$0xff]  }
 0x132   :  { %3442 = vmatprep.subr.bf16.mxu0 %v5800_v12  ;;  %3866 = vmatprep.subr.bf16.mxu1 %v5803_v13  ;;  %v5878_v12 = vld [vmem:[#allocation5 + $0x724] ss:$16 sps:$4 sm:$0xff]   ;;  %v5881_v13 = vld [vmem:[#allocation5 + $0x72c] ss:$16 sps:$4 sm:$0xff]  }
 0x135   :  { %3443 = vmatpush1.bf16.msra.mxu0 %v5798_v14  ;;  %3867 = vmatpush1.bf16.msra.mxu1 %v5801_v15  ;;  %v5876_v14 = vld [vmem:[#allocation5 + $0x720] ss:$16 sps:$4 sm:$0xff]   ;;  %v5879_v15 = vld [vmem:[#allocation5 + $0x728] ss:$16 sps:$4 sm:$0xff]  }
 0x136   :  { %3444 = vmatprep.subr.bf16.mxu0 %v5806_v16  ;;  %3868 = vmatprep.subr.bf16.mxu1 %v5809_v17  ;;  %v5884_v16 = vld [vmem:[#allocation5 + $0x744] ss:$16 sps:$4 sm:$0xff]   ;;  %v5887_v17 = vld [vmem:[#allocation5 + $0x74c] ss:$16 sps:$4 sm:$0xff]  }
 0x139   :  { %3445 = vmatpush1.bf16.msra.mxu0 %v5804_v18  ;;  %3869 = vmatpush1.bf16.msra.mxu1 %v5807_v19  ;;  %v5882_v18 = vld [vmem:[#allocation5 + $0x740] ss:$16 sps:$4 sm:$0xff]   ;;  %v5885_v19 = vld [vmem:[#allocation5 + $0x748] ss:$16 sps:$4 sm:$0xff]  }
 0x13a   :  { %3446 = vmatprep.subr.bf16.mxu0 %v5812_v20  ;;  %3870 = vmatprep.subr.bf16.mxu1 %v5815_v21  ;;  %v5890_v20 = vld [vmem:[#allocation5 + $0x764] ss:$16 sps:$4 sm:$0xff]   ;;  %v5893_v21 = vld [vmem:[#allocation5 + $0x76c] ss:$16 sps:$4 sm:$0xff]  }
 0x13d   :  { %3447 = vmatpush1.bf16.msra.mxu0 %v5810_v22  ;;  %3871 = vmatpush1.bf16.msra.mxu1 %v5813_v23  ;;  %v5888_v22 = vld [vmem:[#allocation5 + $0x760] ss:$16 sps:$4 sm:$0xff]   ;;  %v5891_v23 = vld [vmem:[#allocation5 + $0x768] ss:$16 sps:$4 sm:$0xff]  }
 0x13e   :  { %3448 = vmatprep.subr.bf16.mxu0 %v5818_v24  ;;  %3872 = vmatprep.subr.bf16.mxu1 %v5821_v25  ;;  %v5896_v24 = vld [vmem:[#allocation5 + $0x784] ss:$16 sps:$4 sm:$0xff]   ;;  %v5899_v25 = vld [vmem:[#allocation5 + $0x78c] ss:$16 sps:$4 sm:$0xff]  }
 0x141   :  { %3449 = vmatpush1.bf16.msra.mxu0 %v5816_v26  ;;  %3873 = vmatpush1.bf16.msra.mxu1 %v5819_v27  ;;  %v5894_v26 = vld [vmem:[#allocation5 + $0x780] ss:$16 sps:$4 sm:$0xff]   ;;  %v5897_v27 = vld [vmem:[#allocation5 + $0x788] ss:$16 sps:$4 sm:$0xff]  }
 0x142   :  { %3471 = vmatprep.subr.bf16.mxu0 %v5824_v28  ;;  %3895 = vmatprep.subr.bf16.mxu1 %v5827_v31  ;;  %v5902_v28 = vld [vmem:[#allocation5 + $0x7a4] ss:$16 sps:$4 sm:$0xff]   ;;  %v5903_v31 = vld [vmem:[#allocation5 + $0x7a8] ss:$16 sps:$4 sm:$0xff]  }
 0x144   :  { %3451 = vmatmul.mubr.bf16.vlgmr.msra.gmra.mrb[0].mxu0 %v190_v34  ;;  %3875 = vmatmul.mubr.bf16.vlgmr.msra.gmra.mrb[0].mxu1 %v190_v34  ;;  %v5906_v34 = vld [vmem:[#allocation5 + $0x7c0] ss:$16 sps:$4 sm:$0xff]  }
 0x145   :  { %3472 = vmatpush1.bf16.msra.mxu0 %v5822_v32  ;;  %3896 = vmatpush1.bf16.msra.mxu1 %v5825_v33  ;;  %v5908_v32 = vld [vmem:[#allocation5 + $0x7c4] ss:$16 sps:$4 sm:$0xff]   ;;  %v5911_v33 = vld [vmem:[#allocation5 + $0x7cc] ss:$16 sps:$4 sm:$0xff]  }
 0x146   :  { %3473 = vmatprep.subr.bf16.mxu0 %v5830_v37  ;;  %3897 = vmatprep.subr.bf16.mxu1 %v5833_v38  ;;  %v5917_v37 = vld [vmem:[#allocation5 + $0x7ec] ss:$16 sps:$4 sm:$0xff]   ;;  %v5912_v38 = vld [vmem:[#allocation5 + $0x7e0] ss:$16 sps:$4 sm:$0xff]  }
 0x147   :  { %3460 = vmatprep.mubr.bf16.mxu0 %v207_v41  ;;  %3884 = vmatprep.mubr.bf16.mxu1 %v207_v41  ;;  %v128_v41 = vld [vmem:[#allocation3 + $0x30] sm:$0xff] }
 0x149   :  { %3474 = vmatpush1.bf16.msra.mxu0 %v5828_v39  ;;  %3898 = vmatpush1.bf16.msra.mxu1 %v5831_v40  ;;  %v5915_v39 = vld [vmem:[#allocation5 + $0x7e8] ss:$16 sps:$4 sm:$0xff]   ;;  %v5920_v40 = vld [vmem:[#allocation5 + $0x804] ss:$16 sps:$4 sm:$0xff]  }
 0x14a   :  { %3475 = vmatprep.subr.bf16.mxu0 %v5836_v42  ;;  %3899 = vmatprep.subr.bf16.mxu1 %v5839_v45  ;;  %v144_v42 = vld [vmem:[#allocation3 + $0xb0] sm:$0xff]  ;;  %v5921_v45 = vld [vmem:[#allocation5 + $0x808] ss:$16 sps:$4 sm:$0xff]  }
 0x14c   :  { %3461 = vmatmul.mubr.bf16.gmra.mrb[4].mxu0 %v206_v48  ;;  %3885 = vmatmul.mubr.bf16.gmra.mrb[4].mxu1 %v206_v48  ;;  %v177_v48 = vld [vmem:[#allocation3 + $0x1b8] sm:$0xff] }
 0x14d   :  { %3476 = vmatpush1.bf16.msra.mxu0 %v5834_v46  ;;  %3900 = vmatpush1.bf16.msra.mxu1 %v5837_v47  ;;  %v192_v46 = vpack.c.bf16 %v144_v42, %v128_v41  ;;  %v161_v47 = vld [vmem:[#allocation3 + $0x138] sm:$0xff]  ;;  %v5996_v42 = vld [vmem:[#allocation5 + $0x9a0] ss:$16 sps:$4 sm:$0xff]  }
 0x14e   :  { %3477 = vmatprep.subr.bf16.mxu0 %v5842_v51  ;;  %3901 = vmatprep.subr.bf16.mxu1 %v5845_v52  ;;  %v5924_v51 = vld [vmem:[#allocation5 + $0x820] ss:$16 sps:$4 sm:$0xff]   ;;  %v5927_v52 = vld [vmem:[#allocation5 + $0x828] ss:$16 sps:$4 sm:$0xff]   ;;  %v6001_v41 = vld [vmem:[#allocation5 + $0x9ac] ss:$16 sps:$4 sm:$0xff]  }
 0x14f   :  { %3503 = vmatprep.mubr.bf16.mxu0 %v193_v53  ;;  %3927 = vmatprep.mubr.bf16.mxu1 %v193_v53  ;;  %v209_v53 = vpack.c.bf16 %v177_v48, %v161_v47  ;;  %v6005_v47 = vld [vmem:[#allocation5 + $0x9c8] ss:$16 sps:$4 sm:$0xff]   ;;  %v6010_v48 = vld [vmem:[#allocation5 + $0x9e4] ss:$16 sps:$4 sm:$0xff]  }
 0x151   :  { %3478 = vmatpush1.bf16.msra.mxu0 %v5840_v54  ;;  %3902 = vmatpush1.bf16.msra.mxu1 %v5843_v55  ;;  %v5932_v54 = vld [vmem:[#allocation5 + $0x844] ss:$16 sps:$4 sm:$0xff]  }
 0x152   :  { %3479 = vmatprep.subr.bf16.mxu0 %v5848_v56  ;;  %3903 = vmatprep.subr.bf16.mxu1 %v5851_v57  ;;  %v160_v55 = vld [vmem:[#allocation3 + $0x130] sm:$0xff]  ;;  %v5935_v57 = vld [vmem:[#allocation5 + $0x84c] ss:$16 sps:$4 sm:$0xff]  }
 0x153   :  { %v176_v56 = vld [vmem:[#allocation3 + $0x1b0] sm:$0xff] }
 0x155   :  { %3480 = vmatpush1.bf16.msra.mxu0 %v5846_v58  ;;  %3904 = vmatpush1.bf16.msra.mxu1 %v5849_v59  ;;  %v131_v58 = vld [vmem:[#allocation3 + $0x48] sm:$0xff]  ;;  %v208_v59 = vpack.c.bf16 %v176_v56, %v160_v55  ;;  %v146_v55 = vld [vmem:[#allocation3 + $0xc0] sm:$0xff] }
 0x156   :  { %3481 = vmatprep.subr.bf16.mxu0 %v5854_v60  ;;  %3905 = vmatprep.subr.bf16.mxu1 %v5857_v61  ;;  %v147_v60 = vld [vmem:[#allocation3 + $0xc8] sm:$0xff]  ;;  %v5930_v61 = vld [vmem:[#allocation5 + $0x840] ss:$16 sps:$4 sm:$0xff]  }
 0x157   :  { %v163_v56 = vld [vmem:[#allocation3 + $0x148] sm:$0xff] }
 0x159   :  { %3482 = vmatpush1.bf16.msra.mxu0 %v5852_v62  ;;  %3906 = vmatpush1.bf16.msra.mxu1 %v5855_v63  ;;  %v5933_v62 = vld [vmem:[#allocation5 + $0x848] ss:$16 sps:$4 sm:$0xff]   ;;  %v5938_v63 = vld [vmem:[#allocation5 + $0x864] ss:$16 sps:$4 sm:$0xff]  }
 0x15a   :  { %3483 = vmatprep.subr.bf16.mxu0 %v5860_v0  ;;  %3907 = vmatprep.subr.bf16.mxu1 %v5863_v1  ;;  %v5941_v0 = vld [vmem:[#allocation5 + $0x86c] ss:$16 sps:$4 sm:$0xff]   ;;  %v195_v1 = vpack.c.bf16 %v147_v60, %v131_v58  ;;  %v6017_v60 = vld [vmem:[#allocation5 + $0xa08] ss:$16 sps:$4 sm:$0xff]  }
 0x15d   :  { %3484 = vmatpush1.bf16.msra.mxu0 %v5858_v2  ;;  %3908 = vmatpush1.bf16.msra.mxu1 %v5861_v3  ;;  %v5936_v2 = vld [vmem:[#allocation5 + $0x860] ss:$16 sps:$4 sm:$0xff]   ;;  %v5939_v3 = vld [vmem:[#allocation5 + $0x868] ss:$16 sps:$4 sm:$0xff]  }
 0x15e   :  { %3485 = vmatprep.subr.bf16.mxu0 %v5866_v4  ;;  %3909 = vmatprep.subr.bf16.mxu1 %v5869_v5  ;;  %v5944_v4 = vld [vmem:[#allocation5 + $0x884] ss:$16 sps:$4 sm:$0xff]   ;;  %v5947_v5 = vld [vmem:[#allocation5 + $0x88c] ss:$16 sps:$4 sm:$0xff]  }
 0x161   :  { %3486 = vmatpush1.bf16.msra.mxu0 %v5864_v6  ;;  %3910 = vmatpush1.bf16.msra.mxu1 %v5867_v7  ;;  %v5942_v6 = vld [vmem:[#allocation5 + $0x880] ss:$16 sps:$4 sm:$0xff]   ;;  %v5945_v7 = vld [vmem:[#allocation5 + $0x888] ss:$16 sps:$4 sm:$0xff]  }
 0x162   :  { %3487 = vmatprep.subr.bf16.mxu0 %v5872_v8  ;;  %3911 = vmatprep.subr.bf16.mxu1 %v5875_v9  ;;  %v5950_v8 = vld [vmem:[#allocation5 + $0x8a4] ss:$16 sps:$4 sm:$0xff]   ;;  %v5953_v9 = vld [vmem:[#allocation5 + $0x8ac] ss:$16 sps:$4 sm:$0xff]  }
 0x165   :  { %3488 = vmatpush1.bf16.msra.mxu0 %v5870_v10  ;;  %3912 = vmatpush1.bf16.msra.mxu1 %v5873_v11  ;;  %v5948_v10 = vld [vmem:[#allocation5 + $0x8a0] ss:$16 sps:$4 sm:$0xff]   ;;  %v5951_v11 = vld [vmem:[#allocation5 + $0x8a8] ss:$16 sps:$4 sm:$0xff]  }
 0x166   :  { %3489 = vmatprep.subr.bf16.mxu0 %v5878_v12  ;;  %3913 = vmatprep.subr.bf16.mxu1 %v5881_v13  ;;  %v5956_v12 = vld [vmem:[#allocation5 + $0x8c4] ss:$16 sps:$4 sm:$0xff]   ;;  %v5959_v13 = vld [vmem:[#allocation5 + $0x8cc] ss:$16 sps:$4 sm:$0xff]  }
 0x169   :  { %3490 = vmatpush1.bf16.msra.mxu0 %v5876_v14  ;;  %3914 = vmatpush1.bf16.msra.mxu1 %v5879_v15  ;;  %v5954_v14 = vld [vmem:[#allocation5 + $0x8c0] ss:$16 sps:$4 sm:$0xff]   ;;  %v5957_v15 = vld [vmem:[#allocation5 + $0x8c8] ss:$16 sps:$4 sm:$0xff]  }
 0x16a   :  { %3491 = vmatprep.subr.bf16.mxu0 %v5884_v16  ;;  %3915 = vmatprep.subr.bf16.mxu1 %v5887_v17  ;;  %v5962_v16 = vld [vmem:[#allocation5 + $0x8e4] ss:$16 sps:$4 sm:$0xff]   ;;  %v5965_v17 = vld [vmem:[#allocation5 + $0x8ec] ss:$16 sps:$4 sm:$0xff]  }
 0x16d   :  { %3492 = vmatpush1.bf16.msra.mxu0 %v5882_v18  ;;  %3916 = vmatpush1.bf16.msra.mxu1 %v5885_v19  ;;  %v5960_v18 = vld [vmem:[#allocation5 + $0x8e0] ss:$16 sps:$4 sm:$0xff]   ;;  %v5963_v19 = vld [vmem:[#allocation5 + $0x8e8] ss:$16 sps:$4 sm:$0xff]  }
 0x16e   :  { %3493 = vmatprep.subr.bf16.mxu0 %v5890_v20  ;;  %3917 = vmatprep.subr.bf16.mxu1 %v5893_v21  ;;  %v5968_v20 = vld [vmem:[#allocation5 + $0x904] ss:$16 sps:$4 sm:$0xff]   ;;  %v5971_v21 = vld [vmem:[#allocation5 + $0x90c] ss:$16 sps:$4 sm:$0xff]  }
 0x171   :  { %3494 = vmatpush1.bf16.msra.mxu0 %v5888_v22  ;;  %3918 = vmatpush1.bf16.msra.mxu1 %v5891_v23  ;;  %v5966_v22 = vld [vmem:[#allocation5 + $0x900] ss:$16 sps:$4 sm:$0xff]   ;;  %v5969_v23 = vld [vmem:[#allocation5 + $0x908] ss:$16 sps:$4 sm:$0xff]  }
 0x172   :  { %3495 = vmatprep.subr.bf16.mxu0 %v5896_v24  ;;  %3919 = vmatprep.subr.bf16.mxu1 %v5899_v25  ;;  %v5974_v24 = vld [vmem:[#allocation5 + $0x924] ss:$16 sps:$4 sm:$0xff]   ;;  %v5977_v25 = vld [vmem:[#allocation5 + $0x92c] ss:$16 sps:$4 sm:$0xff]  }
 0x175   :  { %3496 = vmatpush1.bf16.msra.mxu0 %v5894_v26  ;;  %3920 = vmatpush1.bf16.msra.mxu1 %v5897_v27  ;;  %v5972_v26 = vld [vmem:[#allocation5 + $0x920] ss:$16 sps:$4 sm:$0xff]   ;;  %v5975_v27 = vld [vmem:[#allocation5 + $0x928] ss:$16 sps:$4 sm:$0xff]  }
 0x176   :  { %3497 = vmatprep.subr.bf16.mxu0 %v5902_v28  ;;  %3921 = vmatprep.subr.bf16.mxu1 %v5905_v29  ;;  %v5980_v28 = vld [vmem:[#allocation5 + $0x944] ss:$16 sps:$4 sm:$0xff]   ;;  %v5983_v29 = vld [vmem:[#allocation5 + $0x94c] ss:$16 sps:$4 sm:$0xff]  }
 0x179   :  { %3498 = vmatpush1.bf16.msra.mxu0 %v5900_v30  ;;  %3922 = vmatpush1.bf16.msra.mxu1 %v5903_v31  ;;  %v5978_v30 = vld [vmem:[#allocation5 + $0x940] ss:$16 sps:$4 sm:$0xff]   ;;  %v5981_v31 = vld [vmem:[#allocation5 + $0x948] ss:$16 sps:$4 sm:$0xff]  }
 0x17a   :  { %3499 = vmatprep.subr.bf16.mxu0 %v5908_v32  ;;  %3923 = vmatprep.subr.bf16.mxu1 %v5911_v33  ;;  %v5986_v32 = vld [vmem:[#allocation5 + $0x964] ss:$16 sps:$4 sm:$0xff]   ;;  %v5989_v33 = vld [vmem:[#allocation5 + $0x96c] ss:$16 sps:$4 sm:$0xff]  }
 0x17d   :  { %3500 = vmatpush1.bf16.msra.mxu0 %v5906_v34  ;;  %3924 = vmatpush1.bf16.msra.mxu1 %v5909_v35  ;;  %v5984_v34 = vld [vmem:[#allocation5 + $0x960] ss:$16 sps:$4 sm:$0xff]   ;;  %v5987_v35 = vld [vmem:[#allocation5 + $0x968] ss:$16 sps:$4 sm:$0xff]  }
 0x17e   :  { %3501 = vmatprep.subr.bf16.mxu0 %v5914_v36  ;;  %3925 = vmatprep.subr.bf16.mxu1 %v5917_v37  ;;  %v5992_v36 = vld [vmem:[#allocation5 + $0x984] ss:$16 sps:$4 sm:$0xff]   ;;  %v5995_v37 = vld [vmem:[#allocation5 + $0x98c] ss:$16 sps:$4 sm:$0xff]  }
 0x181   :  { %3502 = vmatpush1.bf16.msra.mxu0 %v5912_v38  ;;  %3926 = vmatpush1.bf16.msra.mxu1 %v5915_v39  ;;  %v5990_v38 = vld [vmem:[#allocation5 + $0x980] ss:$16 sps:$4 sm:$0xff]   ;;  %v5993_v39 = vld [vmem:[#allocation5 + $0x988] ss:$16 sps:$4 sm:$0xff]  }
 0x182   :  { %3524 = vmatprep.subr.bf16.mxu0 %v5920_v40  ;;  %3948 = vmatprep.subr.bf16.mxu1 %v5923_v43  ;;  %v5998_v40 = vld [vmem:[#allocation5 + $0x9a4] ss:$16 sps:$4 sm:$0xff]   ;;  %v5999_v43 = vld [vmem:[#allocation5 + $0x9a8] ss:$16 sps:$4 sm:$0xff]  }
 0x184   :  { %3504 = vmatmul.mubr.bf16.vlgmr.msra.gmra.mrb[0].mxu0 %v192_v46  ;;  %3928 = vmatmul.mubr.bf16.vlgmr.msra.gmra.mrb[0].mxu1 %v192_v46  ;;  %v6002_v46 = vld [vmem:[#allocation5 + $0x9c0] ss:$16 sps:$4 sm:$0xff]  }
 0x185   :  { %3525 = vmatpush1.bf16.msra.mxu0 %v5918_v44  ;;  %3949 = vmatpush1.bf16.msra.mxu1 %v5921_v45  ;;  %v6004_v44 = vld [vmem:[#allocation5 + $0x9c4] ss:$16 sps:$4 sm:$0xff]   ;;  %v6007_v45 = vld [vmem:[#allocation5 + $0x9cc] ss:$16 sps:$4 sm:$0xff]  }
 0x186   :  { %3526 = vmatprep.subr.bf16.mxu0 %v5926_v49  ;;  %3950 = vmatprep.subr.bf16.mxu1 %v5929_v50  ;;  %v6013_v49 = vld [vmem:[#allocation5 + $0x9ec] ss:$16 sps:$4 sm:$0xff]   ;;  %v6008_v50 = vld [vmem:[#allocation5 + $0x9e0] ss:$16 sps:$4 sm:$0xff]  }
 0x187   :  { %3513 = vmatprep.mubr.bf16.mxu0 %v209_v53  ;;  %3937 = vmatprep.mubr.bf16.mxu1 %v209_v53  ;;  %v6019_v53 = vld [vmem:[#allocation5 + $0xa0c] ss:$16 sps:$4 sm:$0xff]  }
 0x189   :  { %3527 = vmatpush1.bf16.msra.mxu0 %v5924_v51  ;;  %3951 = vmatpush1.bf16.msra.mxu1 %v5927_v52  ;;  %v6011_v51 = vld [vmem:[#allocation5 + $0x9e8] ss:$16 sps:$4 sm:$0xff]   ;;  %v6016_v52 = vld [vmem:[#allocation5 + $0xa04] ss:$16 sps:$4 sm:$0xff]  }
 0x18a   :  { %3528 = vmatprep.subr.bf16.mxu0 %v5932_v54  ;;  %3952 = vmatprep.subr.bf16.mxu1 %v5935_v57  ;;  %v130_v54 = vld [vmem:[#allocation3 + $0x40] sm:$0xff]  ;;  %v179_v57 = vld [vmem:[#allocation3 + $0x1c8] sm:$0xff] }
 0x18b   :  { %v194_v58 = vpack.c.bf16 %v146_v55, %v130_v54  ;;  %v6092_v54 = vld [vmem:[#allocation5 + $0xba0] ss:$16 sps:$4 sm:$0xff]   ;;  %v6095_v55 = vld [vmem:[#allocation5 + $0xba8] ss:$16 sps:$4 sm:$0xff]  }
 0x18c   :  { %3514 = vmatmul.mubr.bf16.gmra.mrb[4].mxu0 %v208_v59  ;;  %3938 = vmatmul.mubr.bf16.gmra.mrb[4].mxu1 %v208_v59  ;;  %v6014_v59 = vld [vmem:[#allocation5 + $0xa00] ss:$16 sps:$4 sm:$0xff]  }
 0x18d   :  { %3529 = vmatpush1.bf16.msra.mxu0 %v5930_v61  ;;  %3953 = vmatpush1.bf16.msra.mxu1 %v5933_v62  ;;  %v6022_v61 = vld [vmem:[#allocation5 + $0xa24] ss:$16 sps:$4 sm:$0xff]   ;;  %v6025_v62 = vld [vmem:[#allocation5 + $0xa2c] ss:$16 sps:$4 sm:$0xff]  }
 0x18e   :  { %3530 = vmatprep.subr.bf16.mxu0 %v5938_v63  ;;  %3954 = vmatprep.subr.bf16.mxu1 %v5941_v0  ;;  %v6020_v63 = vld [vmem:[#allocation5 + $0xa20] ss:$16 sps:$4 sm:$0xff]   ;;  %v6023_v0 = vld [vmem:[#allocation5 + $0xa28] ss:$16 sps:$4 sm:$0xff]  }
 0x18f   :  { %3556 = vmatprep.mubr.bf16.mxu0 %v195_v1  ;;  %3980 = vmatprep.mubr.bf16.mxu1 %v195_v1  ;;  %v211_v1 = vpack.c.bf16 %v179_v57, %v163_v56  ;;  %v6100_v56 = vld [vmem:[#allocation5 + $0xbc4] ss:$16 sps:$4 sm:$0xff]   ;;  %v6103_v57 = vld [vmem:[#allocation5 + $0xbcc] ss:$16 sps:$4 sm:$0xff]  }
 0x191   :  { %3531 = vmatpush1.bf16.msra.mxu0 %v5936_v2  ;;  %3955 = vmatpush1.bf16.msra.mxu1 %v5939_v3  ;;  %v6028_v2 = vld [vmem:[#allocation5 + $0xa44] ss:$16 sps:$4 sm:$0xff]   ;;  %v6031_v3 = vld [vmem:[#allocation5 + $0xa4c] ss:$16 sps:$4 sm:$0xff]  }
 0x192   :  { %3532 = vmatprep.subr.bf16.mxu0 %v5944_v4  ;;  %3956 = vmatprep.subr.bf16.mxu1 %v5947_v5  ;;  %v162_v4 = vld [vmem:[#allocation3 + $0x140] sm:$0xff] }
 0x193   :  { %v178_v5 = vld [vmem:[#allocation3 + $0x1c0] sm:$0xff] }
 0x195   :  { %3533 = vmatpush1.bf16.msra.mxu0 %v5942_v6  ;;  %3957 = vmatpush1.bf16.msra.mxu1 %v5945_v7  ;;  %v133_v6 = vld [vmem:[#allocation3 + $0x58] sm:$0xff] }
 0x196   :  { %3534 = vmatprep.subr.bf16.mxu0 %v5950_v8  ;;  %3958 = vmatprep.subr.bf16.mxu1 %v5953_v9  ;;  %v149_v7 = vld [vmem:[#allocation3 + $0xd8] sm:$0xff]  ;;  %v210_v8 = vpack.c.bf16 %v178_v5, %v162_v4  ;;  %v6026_v9 = vld [vmem:[#allocation5 + $0xa40] ss:$16 sps:$4 sm:$0xff]  }
 0x197   :  { %v6110_v4 = vld [vmem:[#allocation5 + $0xc00] ss:$16 sps:$4 sm:$0xff]   ;;  %v6113_v5 = vld [vmem:[#allocation5 + $0xc08] ss:$16 sps:$4 sm:$0xff]  }
 0x199   :  { %3535 = vmatpush1.bf16.msra.mxu0 %v5948_v10  ;;  %3959 = vmatpush1.bf16.msra.mxu1 %v5951_v11  ;;  %v6029_v10 = vld [vmem:[#allocation5 + $0xa48] ss:$16 sps:$4 sm:$0xff]   ;;  %v6034_v11 = vld [vmem:[#allocation5 + $0xa64] ss:$16 sps:$4 sm:$0xff]  }
 0x19a   :  { %3536 = vmatprep.subr.bf16.mxu0 %v5956_v12  ;;  %3960 = vmatprep.subr.bf16.mxu1 %v5959_v13  ;;  %v6037_v12 = vld [vmem:[#allocation5 + $0xa6c] ss:$16 sps:$4 sm:$0xff]   ;;  %v197_v13 = vpack.c.bf16 %v149_v7, %v133_v6 }
 0x19b   :  { %v165_v7 = vld [vmem:[#allocation3 + $0x158] sm:$0xff] }
 0x19d   :  { %3537 = vmatpush1.bf16.msra.mxu0 %v5954_v14  ;;  %3961 = vmatpush1.bf16.msra.mxu1 %v5957_v15  ;;  %v6032_v14 = vld [vmem:[#allocation5 + $0xa60] ss:$16 sps:$4 sm:$0xff]   ;;  %v6035_v15 = vld [vmem:[#allocation5 + $0xa68] ss:$16 sps:$4 sm:$0xff]  }
 0x19e   :  { %3538 = vmatprep.subr.bf16.mxu0 %v5962_v16  ;;  %3962 = vmatprep.subr.bf16.mxu1 %v5965_v17  ;;  %v6040_v16 = vld [vmem:[#allocation5 + $0xa84] ss:$16 sps:$4 sm:$0xff]   ;;  %v6043_v17 = vld [vmem:[#allocation5 + $0xa8c] ss:$16 sps:$4 sm:$0xff]  }
 0x1a1   :  { %3539 = vmatpush1.bf16.msra.mxu0 %v5960_v18  ;;  %3963 = vmatpush1.bf16.msra.mxu1 %v5963_v19  ;;  %v6038_v18 = vld [vmem:[#allocation5 + $0xa80] ss:$16 sps:$4 sm:$0xff]   ;;  %v6041_v19 = vld [vmem:[#allocation5 + $0xa88] ss:$16 sps:$4 sm:$0xff]  }
 0x1a2   :  { %3540 = vmatprep.subr.bf16.mxu0 %v5968_v20  ;;  %3964 = vmatprep.subr.bf16.mxu1 %v5971_v21  ;;  %v6046_v20 = vld [vmem:[#allocation5 + $0xaa4] ss:$16 sps:$4 sm:$0xff]   ;;  %v6049_v21 = vld [vmem:[#allocation5 + $0xaac] ss:$16 sps:$4 sm:$0xff]  }
 0x1a5   :  { %3541 = vmatpush1.bf16.msra.mxu0 %v5966_v22  ;;  %3965 = vmatpush1.bf16.msra.mxu1 %v5969_v23  ;;  %v6044_v22 = vld [vmem:[#allocation5 + $0xaa0] ss:$16 sps:$4 sm:$0xff]   ;;  %v6047_v23 = vld [vmem:[#allocation5 + $0xaa8] ss:$16 sps:$4 sm:$0xff]  }
 0x1a6   :  { %3542 = vmatprep.subr.bf16.mxu0 %v5974_v24  ;;  %3966 = vmatprep.subr.bf16.mxu1 %v5977_v25  ;;  %v6052_v24 = vld [vmem:[#allocation5 + $0xac4] ss:$16 sps:$4 sm:$0xff]   ;;  %v6055_v25 = vld [vmem:[#allocation5 + $0xacc] ss:$16 sps:$4 sm:$0xff]  }
 0x1a9   :  { %3543 = vmatpush1.bf16.msra.mxu0 %v5972_v26  ;;  %3967 = vmatpush1.bf16.msra.mxu1 %v5975_v27  ;;  %v6050_v26 = vld [vmem:[#allocation5 + $0xac0] ss:$16 sps:$4 sm:$0xff]   ;;  %v6053_v27 = vld [vmem:[#allocation5 + $0xac8] ss:$16 sps:$4 sm:$0xff]  }
 0x1aa   :  { %3544 = vmatprep.subr.bf16.mxu0 %v5980_v28  ;;  %3968 = vmatprep.subr.bf16.mxu1 %v5983_v29  ;;  %v6058_v28 = vld [vmem:[#allocation5 + $0xae4] ss:$16 sps:$4 sm:$0xff]   ;;  %v6061_v29 = vld [vmem:[#allocation5 + $0xaec] ss:$16 sps:$4 sm:$0xff]  }
 0x1ad   :  { %3545 = vmatpush1.bf16.msra.mxu0 %v5978_v30  ;;  %3969 = vmatpush1.bf16.msra.mxu1 %v5981_v31  ;;  %v6056_v30 = vld [vmem:[#allocation5 + $0xae0] ss:$16 sps:$4 sm:$0xff]   ;;  %v6059_v31 = vld [vmem:[#allocation5 + $0xae8] ss:$16 sps:$4 sm:$0xff]  }
 0x1ae   :  { %3546 = vmatprep.subr.bf16.mxu0 %v5986_v32  ;;  %3970 = vmatprep.subr.bf16.mxu1 %v5989_v33  ;;  %v6064_v32 = vld [vmem:[#allocation5 + $0xb04] ss:$16 sps:$4 sm:$0xff]   ;;  %v6067_v33 = vld [vmem:[#allocation5 + $0xb0c] ss:$16 sps:$4 sm:$0xff]  }
 0x1b1   :  { %3547 = vmatpush1.bf16.msra.mxu0 %v5984_v34  ;;  %3971 = vmatpush1.bf16.msra.mxu1 %v5987_v35  ;;  %v6062_v34 = vld [vmem:[#allocation5 + $0xb00] ss:$16 sps:$4 sm:$0xff]   ;;  %v6065_v35 = vld [vmem:[#allocation5 + $0xb08] ss:$16 sps:$4 sm:$0xff]  }
 0x1b2   :  { %3548 = vmatprep.subr.bf16.mxu0 %v5992_v36  ;;  %3972 = vmatprep.subr.bf16.mxu1 %v5995_v37  ;;  %v6070_v36 = vld [vmem:[#allocation5 + $0xb24] ss:$16 sps:$4 sm:$0xff]   ;;  %v6073_v37 = vld [vmem:[#allocation5 + $0xb2c] ss:$16 sps:$4 sm:$0xff]  }
 0x1b5   :  { %3549 = vmatpush1.bf16.msra.mxu0 %v5990_v38  ;;  %3973 = vmatpush1.bf16.msra.mxu1 %v5993_v39  ;;  %v6068_v38 = vld [vmem:[#allocation5 + $0xb20] ss:$16 sps:$4 sm:$0xff]   ;;  %v6071_v39 = vld [vmem:[#allocation5 + $0xb28] ss:$16 sps:$4 sm:$0xff]  }
 0x1b6   :  { %3550 = vmatprep.subr.bf16.mxu0 %v5998_v40  ;;  %3974 = vmatprep.subr.bf16.mxu1 %v6001_v41  ;;  %v6076_v40 = vld [vmem:[#allocation5 + $0xb44] ss:$16 sps:$4 sm:$0xff]   ;;  %v6079_v41 = vld [vmem:[#allocation5 + $0xb4c] ss:$16 sps:$4 sm:$0xff]  }
 0x1b9   :  { %3551 = vmatpush1.bf16.msra.mxu0 %v5996_v42  ;;  %3975 = vmatpush1.bf16.msra.mxu1 %v5999_v43  ;;  %v6074_v42 = vld [vmem:[#allocation5 + $0xb40] ss:$16 sps:$4 sm:$0xff]   ;;  %v6077_v43 = vld [vmem:[#allocation5 + $0xb48] ss:$16 sps:$4 sm:$0xff]  }
 0x1ba   :  { %3552 = vmatprep.subr.bf16.mxu0 %v6004_v44  ;;  %3976 = vmatprep.subr.bf16.mxu1 %v6007_v45  ;;  %v6082_v44 = vld [vmem:[#allocation5 + $0xb64] ss:$16 sps:$4 sm:$0xff]   ;;  %v6085_v45 = vld [vmem:[#allocation5 + $0xb6c] ss:$16 sps:$4 sm:$0xff]  }
 0x1bd   :  { %3553 = vmatpush1.bf16.msra.mxu0 %v6002_v46  ;;  %3977 = vmatpush1.bf16.msra.mxu1 %v6005_v47  ;;  %v6080_v46 = vld [vmem:[#allocation5 + $0xb60] ss:$16 sps:$4 sm:$0xff]   ;;  %v6083_v47 = vld [vmem:[#allocation5 + $0xb68] ss:$16 sps:$4 sm:$0xff]  }
 0x1be   :  { %3554 = vmatprep.subr.bf16.mxu0 %v6010_v48  ;;  %3978 = vmatprep.subr.bf16.mxu1 %v6013_v49  ;;  %v6088_v48 = vld [vmem:[#allocation5 + $0xb84] ss:$16 sps:$4 sm:$0xff]   ;;  %v6091_v49 = vld [vmem:[#allocation5 + $0xb8c] ss:$16 sps:$4 sm:$0xff]  }
 0x1c1   :  { %3555 = vmatpush1.bf16.msra.mxu0 %v6008_v50  ;;  %3979 = vmatpush1.bf16.msra.mxu1 %v6011_v51  ;;  %v6086_v50 = vld [vmem:[#allocation5 + $0xb80] ss:$16 sps:$4 sm:$0xff]   ;;  %v6089_v51 = vld [vmem:[#allocation5 + $0xb88] ss:$16 sps:$4 sm:$0xff]  }
 0x1c2   :  { %3577 = vmatprep.subr.bf16.mxu0 %v6016_v52  ;;  %4001 = vmatprep.subr.bf16.mxu1 %v6019_v53  ;;  %v6094_v52 = vld [vmem:[#allocation5 + $0xba4] ss:$16 sps:$4 sm:$0xff]   ;;  %v6097_v53 = vld [vmem:[#allocation5 + $0xbac] ss:$16 sps:$4 sm:$0xff]  }
 0x1c4   :  { %3557 = vmatmul.mubr.bf16.vlgmr.msra.gmra.mrb[0].mxu0 %v194_v58  ;;  %3981 = vmatmul.mubr.bf16.vlgmr.msra.gmra.mrb[0].mxu1 %v194_v58  ;;  %v6098_v58 = vld [vmem:[#allocation5 + $0xbc0] ss:$16 sps:$4 sm:$0xff]  }
 0x1c5   :  { %3578 = vmatpush1.bf16.msra.mxu0 %v6014_v59  ;;  %4002 = vmatpush1.bf16.msra.mxu1 %v6017_v60  ;;  %v6101_v59 = vld [vmem:[#allocation5 + $0xbc8] ss:$16 sps:$4 sm:$0xff]   ;;  %v6106_v60 = vld [vmem:[#allocation5 + $0xbe4] ss:$16 sps:$4 sm:$0xff]  }
 0x1c6   :  { %3579 = vmatprep.subr.bf16.mxu0 %v6022_v61  ;;  %4003 = vmatprep.subr.bf16.mxu1 %v6025_v62  ;;  %v6109_v61 = vld [vmem:[#allocation5 + $0xbec] ss:$16 sps:$4 sm:$0xff]   ;;  %v6104_v62 = vld [vmem:[#allocation5 + $0xbe0] ss:$16 sps:$4 sm:$0xff]  }
 0x1c7   :  { %3566 = vmatprep.mubr.bf16.mxu0 %v211_v1  ;;  %3990 = vmatprep.mubr.bf16.mxu1 %v211_v1  ;;  %v148_v1 = vld [vmem:[#allocation3 + $0xd0] sm:$0xff] }
 0x1c9   :  { %3580 = vmatpush1.bf16.msra.mxu0 %v6020_v63  ;;  %4004 = vmatpush1.bf16.msra.mxu1 %v6023_v0  ;;  %v6107_v63 = vld [vmem:[#allocation5 + $0xbe8] ss:$16 sps:$4 sm:$0xff]   ;;  %v132_v0 = vld [vmem:[#allocation3 + $0x50] sm:$0xff] }
 0x1ca   :  { %3581 = vmatprep.subr.bf16.mxu0 %v6028_v2  ;;  %4005 = vmatprep.subr.bf16.mxu1 %v6031_v3  ;;  %v6112_v2 = vld [vmem:[#allocation5 + $0xc04] ss:$16 sps:$4 sm:$0xff]   ;;  %v6115_v3 = vld [vmem:[#allocation5 + $0xc0c] ss:$16 sps:$4 sm:$0xff]   ;;  %v196_v6 = vpack.c.bf16 %v148_v1, %v132_v0 }
 0x1cb   :  { %v6190_v0 = vld [vmem:[#allocation5 + $0xda4] ss:$16 sps:$4 sm:$0xff]   ;;  %v6193_v1 = vld [vmem:[#allocation5 + $0xdac] ss:$16 sps:$4 sm:$0xff]  }
 0x1cc   :  { %3567 = vmatmul.mubr.bf16.gmra.mrb[4].mxu0 %v210_v8  ;;  %3991 = vmatmul.mubr.bf16.gmra.mrb[4].mxu1 %v210_v8  ;;  %v181_v8 = vld [vmem:[#allocation3 + $0x1d8] sm:$0xff] }
 0x1cd   :  { %3582 = vmatpush1.bf16.msra.mxu0 %v6026_v9  ;;  %4006 = vmatpush1.bf16.msra.mxu1 %v6029_v10  ;;  %v6118_v9 = vld [vmem:[#allocation5 + $0xc24] ss:$16 sps:$4 sm:$0xff]   ;;  %v6121_v10 = vld [vmem:[#allocation5 + $0xc2c] ss:$16 sps:$4 sm:$0xff]  }
 0x1ce   :  { %3583 = vmatprep.subr.bf16.mxu0 %v6034_v11  ;;  %4007 = vmatprep.subr.bf16.mxu1 %v6037_v12  ;;  %v213_v11 = vpack.c.bf16 %v181_v8, %v165_v7  ;;  %v6116_v12 = vld [vmem:[#allocation5 + $0xc20] ss:$16 sps:$4 sm:$0xff]   ;;  %v6197_v7 = vld [vmem:[#allocation5 + $0xdc8] ss:$16 sps:$4 sm:$0xff]   ;;  %v6202_v8 = vld [vmem:[#allocation5 + $0xde4] ss:$16 sps:$4 sm:$0xff]  }
 0x1cf   :  { %3609 = vmatprep.mubr.bf16.mxu0 %v197_v13  ;;  %4033 = vmatprep.mubr.bf16.mxu1 %v197_v13  ;;  %v6119_v13 = vld [vmem:[#allocation5 + $0xc28] ss:$16 sps:$4 sm:$0xff]  }
 0x1d1   :  { %3584 = vmatpush1.bf16.msra.mxu0 %v6032_v14  ;;  %4008 = vmatpush1.bf16.msra.mxu1 %v6035_v15  ;;  %v164_v14 = vld [vmem:[#allocation3 + $0x150] sm:$0xff] }
 0x1d2   :  { %3585 = vmatprep.subr.bf16.mxu0 %v6040_v16  ;;  %4009 = vmatprep.subr.bf16.mxu1 %v6043_v17  ;;  %v180_v15 = vld [vmem:[#allocation3 + $0x1d0] sm:$0xff]  ;;  %v6127_v17 = vld [vmem:[#allocation5 + $0xc4c] ss:$16 sps:$4 sm:$0xff]  }
 0x1d3   :  { %v6124_v16 = vld [vmem:[#allocation5 + $0xc44] ss:$16 sps:$4 sm:$0xff]  }
 0x1d5   :  { %3586 = vmatpush1.bf16.msra.mxu0 %v6038_v18  ;;  %4010 = vmatpush1.bf16.msra.mxu1 %v6041_v19  ;;  %v212_v18 = vpack.c.bf16 %v180_v15, %v164_v14  ;;  %v135_v19 = vld [vmem:[#allocation3 + $0x68] sm:$0xff]  ;;  %v6208_v14 = vld [vmem:[#allocation5 + $0xe04] ss:$16 sps:$4 sm:$0xff]  }
 0x1d6   :  { %3587 = vmatprep.subr.bf16.mxu0 %v6046_v20  ;;  %4011 = vmatprep.subr.bf16.mxu1 %v6049_v21  ;;  %v151_v20 = vld [vmem:[#allocation3 + $0xe8] sm:$0xff]  ;;  %v6122_v21 = vld [vmem:[#allocation5 + $0xc40] ss:$16 sps:$4 sm:$0xff]  }
 0x1d7   :  { %v6211_v15 = vld [vmem:[#allocation5 + $0xe0c] ss:$16 sps:$4 sm:$0xff]  }
 0x1d9   :  { %3588 = vmatpush1.bf16.msra.mxu0 %v6044_v22  ;;  %4012 = vmatpush1.bf16.msra.mxu1 %v6047_v23  ;;  %v6125_v22 = vld [vmem:[#allocation5 + $0xc48] ss:$16 sps:$4 sm:$0xff]   ;;  %v6130_v23 = vld [vmem:[#allocation5 + $0xc64] ss:$16 sps:$4 sm:$0xff]  }
 0x1da   :  { %3589 = vmatprep.subr.bf16.mxu0 %v6052_v24  ;;  %4013 = vmatprep.subr.bf16.mxu1 %v6055_v25  ;;  %v6133_v24 = vld [vmem:[#allocation5 + $0xc6c] ss:$16 sps:$4 sm:$0xff]   ;;  %v199_v25 = vpack.c.bf16 %v151_v20, %v135_v19  ;;  %v6206_v19 = vld [vmem:[#allocation5 + $0xe00] ss:$16 sps:$4 sm:$0xff]   ;;  %v6209_v20 = vld [vmem:[#allocation5 + $0xe08] ss:$16 sps:$4 sm:$0xff]  }
 0x1dd   :  { %3590 = vmatpush1.bf16.msra.mxu0 %v6050_v26  ;;  %4014 = vmatpush1.bf16.msra.mxu1 %v6053_v27  ;;  %v6128_v26 = vld [vmem:[#allocation5 + $0xc60] ss:$16 sps:$4 sm:$0xff]   ;;  %v6131_v27 = vld [vmem:[#allocation5 + $0xc68] ss:$16 sps:$4 sm:$0xff]  }
 0x1de   :  { %3591 = vmatprep.subr.bf16.mxu0 %v6058_v28  ;;  %4015 = vmatprep.subr.bf16.mxu1 %v6061_v29  ;;  %v6136_v28 = vld [vmem:[#allocation5 + $0xc84] ss:$16 sps:$4 sm:$0xff]   ;;  %v6139_v29 = vld [vmem:[#allocation5 + $0xc8c] ss:$16 sps:$4 sm:$0xff]  }
 0x1e1   :  { %3592 = vmatpush1.bf16.msra.mxu0 %v6056_v30  ;;  %4016 = vmatpush1.bf16.msra.mxu1 %v6059_v31  ;;  %v6134_v30 = vld [vmem:[#allocation5 + $0xc80] ss:$16 sps:$4 sm:$0xff]   ;;  %v6137_v31 = vld [vmem:[#allocation5 + $0xc88] ss:$16 sps:$4 sm:$0xff]  }
 0x1e2   :  { %3593 = vmatprep.subr.bf16.mxu0 %v6064_v32  ;;  %4017 = vmatprep.subr.bf16.mxu1 %v6067_v33  ;;  %v6142_v32 = vld [vmem:[#allocation5 + $0xca4] ss:$16 sps:$4 sm:$0xff]   ;;  %v6145_v33 = vld [vmem:[#allocation5 + $0xcac] ss:$16 sps:$4 sm:$0xff]  }
 0x1e5   :  { %3594 = vmatpush1.bf16.msra.mxu0 %v6062_v34  ;;  %4018 = vmatpush1.bf16.msra.mxu1 %v6065_v35  ;;  %v6140_v34 = vld [vmem:[#allocation5 + $0xca0] ss:$16 sps:$4 sm:$0xff]   ;;  %v6143_v35 = vld [vmem:[#allocation5 + $0xca8] ss:$16 sps:$4 sm:$0xff]  }
 0x1e6   :  { %3595 = vmatprep.subr.bf16.mxu0 %v6070_v36  ;;  %4019 = vmatprep.subr.bf16.mxu1 %v6073_v37  ;;  %v6148_v36 = vld [vmem:[#allocation5 + $0xcc4] ss:$16 sps:$4 sm:$0xff]   ;;  %v6151_v37 = vld [vmem:[#allocation5 + $0xccc] ss:$16 sps:$4 sm:$0xff]  }
 0x1e9   :  { %3596 = vmatpush1.bf16.msra.mxu0 %v6068_v38  ;;  %4020 = vmatpush1.bf16.msra.mxu1 %v6071_v39  ;;  %v6146_v38 = vld [vmem:[#allocation5 + $0xcc0] ss:$16 sps:$4 sm:$0xff]   ;;  %v6149_v39 = vld [vmem:[#allocation5 + $0xcc8] ss:$16 sps:$4 sm:$0xff]  }
 0x1ea   :  { %3597 = vmatprep.subr.bf16.mxu0 %v6076_v40  ;;  %4021 = vmatprep.subr.bf16.mxu1 %v6079_v41  ;;  %v6154_v40 = vld [vmem:[#allocation5 + $0xce4] ss:$16 sps:$4 sm:$0xff]   ;;  %v6157_v41 = vld [vmem:[#allocation5 + $0xcec] ss:$16 sps:$4 sm:$0xff]  }
 0x1ed   :  { %3598 = vmatpush1.bf16.msra.mxu0 %v6074_v42  ;;  %4022 = vmatpush1.bf16.msra.mxu1 %v6077_v43  ;;  %v6152_v42 = vld [vmem:[#allocation5 + $0xce0] ss:$16 sps:$4 sm:$0xff]   ;;  %v6155_v43 = vld [vmem:[#allocation5 + $0xce8] ss:$16 sps:$4 sm:$0xff]  }
 0x1ee   :  { %3599 = vmatprep.subr.bf16.mxu0 %v6082_v44  ;;  %4023 = vmatprep.subr.bf16.mxu1 %v6085_v45  ;;  %v6160_v44 = vld [vmem:[#allocation5 + $0xd04] ss:$16 sps:$4 sm:$0xff]   ;;  %v6163_v45 = vld [vmem:[#allocation5 + $0xd0c] ss:$16 sps:$4 sm:$0xff]  }
 0x1f1   :  { %3600 = vmatpush1.bf16.msra.mxu0 %v6080_v46  ;;  %4024 = vmatpush1.bf16.msra.mxu1 %v6083_v47  ;;  %v6158_v46 = vld [vmem:[#allocation5 + $0xd00] ss:$16 sps:$4 sm:$0xff]   ;;  %v6161_v47 = vld [vmem:[#allocation5 + $0xd08] ss:$16 sps:$4 sm:$0xff]  }
 0x1f2   :  { %3601 = vmatprep.subr.bf16.mxu0 %v6088_v48  ;;  %4025 = vmatprep.subr.bf16.mxu1 %v6091_v49  ;;  %v6166_v48 = vld [vmem:[#allocation5 + $0xd24] ss:$16 sps:$4 sm:$0xff]   ;;  %v6169_v49 = vld [vmem:[#allocation5 + $0xd2c] ss:$16 sps:$4 sm:$0xff]  }
 0x1f5   :  { %3602 = vmatpush1.bf16.msra.mxu0 %v6086_v50  ;;  %4026 = vmatpush1.bf16.msra.mxu1 %v6089_v51  ;;  %v6164_v50 = vld [vmem:[#allocation5 + $0xd20] ss:$16 sps:$4 sm:$0xff]   ;;  %v6167_v51 = vld [vmem:[#allocation5 + $0xd28] ss:$16 sps:$4 sm:$0xff]  }
 0x1f6   :  { %3603 = vmatprep.subr.bf16.mxu0 %v6094_v52  ;;  %4027 = vmatprep.subr.bf16.mxu1 %v6097_v53  ;;  %v6172_v52 = vld [vmem:[#allocation5 + $0xd44] ss:$16 sps:$4 sm:$0xff]   ;;  %v6175_v53 = vld [vmem:[#allocation5 + $0xd4c] ss:$16 sps:$4 sm:$0xff]  }
 0x1f9   :  { %3604 = vmatpush1.bf16.msra.mxu0 %v6092_v54  ;;  %4028 = vmatpush1.bf16.msra.mxu1 %v6095_v55  ;;  %v6170_v54 = vld [vmem:[#allocation5 + $0xd40] ss:$16 sps:$4 sm:$0xff]   ;;  %v6173_v55 = vld [vmem:[#allocation5 + $0xd48] ss:$16 sps:$4 sm:$0xff]  }
 0x1fa   :  { %3605 = vmatprep.subr.bf16.mxu0 %v6100_v56  ;;  %4029 = vmatprep.subr.bf16.mxu1 %v6103_v57  ;;  %v6178_v56 = vld [vmem:[#allocation5 + $0xd64] ss:$16 sps:$4 sm:$0xff]   ;;  %v6181_v57 = vld [vmem:[#allocation5 + $0xd6c] ss:$16 sps:$4 sm:$0xff]  }
 0x1fd   :  { %3606 = vmatpush1.bf16.msra.mxu0 %v6098_v58  ;;  %4030 = vmatpush1.bf16.msra.mxu1 %v6101_v59  ;;  %v6176_v58 = vld [vmem:[#allocation5 + $0xd60] ss:$16 sps:$4 sm:$0xff]   ;;  %v6179_v59 = vld [vmem:[#allocation5 + $0xd68] ss:$16 sps:$4 sm:$0xff]  }
 0x1fe   :  { %3607 = vmatprep.subr.bf16.mxu0 %v6106_v60  ;;  %4031 = vmatprep.subr.bf16.mxu1 %v6109_v61  ;;  %v6184_v60 = vld [vmem:[#allocation5 + $0xd84] ss:$16 sps:$4 sm:$0xff]   ;;  %v6187_v61 = vld [vmem:[#allocation5 + $0xd8c] ss:$16 sps:$4 sm:$0xff]  }
 0x201   :  { %3608 = vmatpush1.bf16.msra.mxu0 %v6104_v62  ;;  %4032 = vmatpush1.bf16.msra.mxu1 %v6107_v63  ;;  %v6182_v62 = vld [vmem:[#allocation5 + $0xd80] ss:$16 sps:$4 sm:$0xff]   ;;  %v6185_v63 = vld [vmem:[#allocation5 + $0xd88] ss:$16 sps:$4 sm:$0xff]  }
 0x202   :  { %3630 = vmatprep.subr.bf16.mxu0 %v6112_v2  ;;  %4054 = vmatprep.subr.bf16.mxu1 %v6115_v3  ;;  %v6188_v2 = vld [vmem:[#allocation5 + $0xda0] ss:$16 sps:$4 sm:$0xff]   ;;  %v6191_v3 = vld [vmem:[#allocation5 + $0xda8] ss:$16 sps:$4 sm:$0xff]  }
 0x204   :  { %3610 = vmatmul.mubr.bf16.vlgmr.msra.gmra.mrb[0].mxu0 %v196_v6  ;;  %4034 = vmatmul.mubr.bf16.vlgmr.msra.gmra.mrb[0].mxu1 %v196_v6  ;;  %v6194_v6 = vld [vmem:[#allocation5 + $0xdc0] ss:$16 sps:$4 sm:$0xff]  }
 0x205   :  { %3631 = vmatpush1.bf16.msra.mxu0 %v6110_v4  ;;  %4055 = vmatpush1.bf16.msra.mxu1 %v6113_v5  ;;  %v6196_v4 = vld [vmem:[#allocation5 + $0xdc4] ss:$16 sps:$4 sm:$0xff]   ;;  %v6199_v5 = vld [vmem:[#allocation5 + $0xdcc] ss:$16 sps:$4 sm:$0xff]  }
 0x206   :  { %3632 = vmatprep.subr.bf16.mxu0 %v6118_v9  ;;  %4056 = vmatprep.subr.bf16.mxu1 %v6121_v10  ;;  %v6205_v9 = vld [vmem:[#allocation5 + $0xdec] ss:$16 sps:$4 sm:$0xff]   ;;  %v6200_v10 = vld [vmem:[#allocation5 + $0xde0] ss:$16 sps:$4 sm:$0xff]  }
 0x207   :  { %3619 = vmatprep.mubr.bf16.mxu0 %v213_v11  ;;  %4043 = vmatprep.mubr.bf16.mxu1 %v213_v11  ;;  %v6203_v11 = vld [vmem:[#allocation5 + $0xde8] ss:$16 sps:$4 sm:$0xff]  }
 0x209   :  { %3633 = vmatpush1.bf16.msra.mxu0 %v6116_v12  ;;  %4057 = vmatpush1.bf16.msra.mxu1 %v6119_v13  ;;  %v134_v12 = vld [vmem:[#allocation3 + $0x60] sm:$0xff] }
 0x20a   :  { %3634 = vmatprep.subr.bf16.mxu0 %v6124_v16  ;;  %4058 = vmatprep.subr.bf16.mxu1 %v6127_v17  ;;  %v150_v13 = vld [vmem:[#allocation3 + $0xe0] sm:$0xff]  ;;  %v167_v17 = vld [vmem:[#allocation3 + $0x168] sm:$0xff] }
 0x20b   :  { %v198_v16 = vpack.c.bf16 %v150_v13, %v134_v12  ;;  %v6286_v12 = vld [vmem:[#allocation5 + $0xfa4] ss:$16 sps:$4 sm:$0xff]   ;;  %v6289_v13 = vld [vmem:[#allocation5 + $0xfac] ss:$16 sps:$4 sm:$0xff]  }
 0x20c   :  { %3620 = vmatmul.mubr.bf16.gmra.mrb[4].mxu0 %v212_v18  ;;  %4044 = vmatmul.mubr.bf16.gmra.mrb[4].mxu1 %v212_v18  ;;  %v183_v18 = vld [vmem:[#allocation3 + $0x1e8] sm:$0xff] }
 0x20d   :  { %3635 = vmatpush1.bf16.msra.mxu0 %v6122_v21  ;;  %4059 = vmatpush1.bf16.msra.mxu1 %v6125_v22  ;;  %v6214_v21 = vld [vmem:[#allocation5 + $0xe24] ss:$16 sps:$4 sm:$0xff]   ;;  %v6217_v22 = vld [vmem:[#allocation5 + $0xe2c] ss:$16 sps:$4 sm:$0xff]  }
 0x20e   :  { %3636 = vmatprep.subr.bf16.mxu0 %v6130_v23  ;;  %4060 = vmatprep.subr.bf16.mxu1 %v6133_v24  ;;  %v215_v23 = vpack.c.bf16 %v183_v18, %v167_v17  ;;  %v6212_v24 = vld [vmem:[#allocation5 + $0xe20] ss:$16 sps:$4 sm:$0xff]   ;;  %v6295_v17 = vld [vmem:[#allocation5 + $0xfcc] ss:$16 sps:$4 sm:$0xff]  }
 0x20f   :  { %3662 = vmatprep.mubr.bf16.mxu0 %v199_v25  ;;  %4086 = vmatprep.mubr.bf16.mxu1 %v199_v25  ;;  %v6215_v25 = vld [vmem:[#allocation5 + $0xe28] ss:$16 sps:$4 sm:$0xff]   ;;  %v6290_v18 = vld [vmem:[#allocation5 + $0xfc0] ss:$16 sps:$4 sm:$0xff]  }
 0x211   :  { %3637 = vmatpush1.bf16.msra.mxu0 %v6128_v26  ;;  %4061 = vmatpush1.bf16.msra.mxu1 %v6131_v27  ;;  %v166_v26 = vld [vmem:[#allocation3 + $0x160] sm:$0xff] }
 0x212   :  { %3638 = vmatprep.subr.bf16.mxu0 %v6136_v28  ;;  %4062 = vmatprep.subr.bf16.mxu1 %v6139_v29  ;;  %v182_v27 = vld [vmem:[#allocation3 + $0x1e0] sm:$0xff]  ;;  %v6223_v29 = vld [vmem:[#allocation5 + $0xe4c] ss:$16 sps:$4 sm:$0xff]  }
 0x213   :  { %v6220_v28 = vld [vmem:[#allocation5 + $0xe44] ss:$16 sps:$4 sm:$0xff]  }
 0x215   :  { %3639 = vmatpush1.bf16.msra.mxu0 %v6134_v30  ;;  %4063 = vmatpush1.bf16.msra.mxu1 %v6137_v31  ;;  %v214_v30 = vpack.c.bf16 %v182_v27, %v166_v26  ;;  %v137_v31 = vld [vmem:[#allocation3 + $0x78] sm:$0xff] }
 0x216   :  { %3640 = vmatprep.subr.bf16.mxu0 %v6142_v32  ;;  %4064 = vmatprep.subr.bf16.mxu1 %v6145_v33  ;;  %v153_v32 = vld [vmem:[#allocation3 + $0xf8] sm:$0xff]  ;;  %v6218_v33 = vld [vmem:[#allocation5 + $0xe40] ss:$16 sps:$4 sm:$0xff]  }
 0x217   :  { %v169_v26 = vld [vmem:[#allocation3 + $0x178] sm:$0xff] }
 0x218   :  { %v185_v27 = vld [vmem:[#allocation3 + $0x1f8] sm:$0xff] }
 0x219   :  { %3641 = vmatpush1.bf16.msra.mxu0 %v6140_v34  ;;  %4065 = vmatpush1.bf16.msra.mxu1 %v6143_v35  ;;  %v6221_v34 = vld [vmem:[#allocation5 + $0xe48] ss:$16 sps:$4 sm:$0xff]   ;;  %v6226_v35 = vld [vmem:[#allocation5 + $0xe64] ss:$16 sps:$4 sm:$0xff]  }
 0x21a   :  { %3642 = vmatprep.subr.bf16.mxu0 %v6148_v36  ;;  %4066 = vmatprep.subr.bf16.mxu1 %v6151_v37  ;;  %v6229_v36 = vld [vmem:[#allocation5 + $0xe6c] ss:$16 sps:$4 sm:$0xff]   ;;  %v201_v37 = vpack.c.bf16 %v153_v32, %v137_v31  ;;  %v217_v31 = vpack.c.bf16 %v185_v27, %v169_v26  ;;  %v6304_v32 = vld [vmem:[#allocation8] sm:$0xff]  }
 0x21d   :  { %3643 = vmatpush1.bf16.msra.mxu0 %v6146_v38  ;;  %4067 = vmatpush1.bf16.msra.mxu1 %v6149_v39  ;;  %v6224_v38 = vld [vmem:[#allocation5 + $0xe60] ss:$16 sps:$4 sm:$0xff]   ;;  %v6227_v39 = vld [vmem:[#allocation5 + $0xe68] ss:$16 sps:$4 sm:$0xff]  }
 0x21e   :  { %3644 = vmatprep.subr.bf16.mxu0 %v6154_v40  ;;  %4068 = vmatprep.subr.bf16.mxu1 %v6157_v41  ;;  %v6232_v40 = vld [vmem:[#allocation5 + $0xe84] ss:$16 sps:$4 sm:$0xff]   ;;  %v6235_v41 = vld [vmem:[#allocation5 + $0xe8c] ss:$16 sps:$4 sm:$0xff]  }
 0x221   :  { %3645 = vmatpush1.bf16.msra.mxu0 %v6152_v42  ;;  %4069 = vmatpush1.bf16.msra.mxu1 %v6155_v43  ;;  %v6230_v42 = vld [vmem:[#allocation5 + $0xe80] ss:$16 sps:$4 sm:$0xff]   ;;  %v6233_v43 = vld [vmem:[#allocation5 + $0xe88] ss:$16 sps:$4 sm:$0xff]  }
 0x222   :  { %3646 = vmatprep.subr.bf16.mxu0 %v6160_v44  ;;  %4070 = vmatprep.subr.bf16.mxu1 %v6163_v45  ;;  %v6238_v44 = vld [vmem:[#allocation5 + $0xea4] ss:$16 sps:$4 sm:$0xff]   ;;  %v6241_v45 = vld [vmem:[#allocation5 + $0xeac] ss:$16 sps:$4 sm:$0xff]  }
 0x225   :  { %3647 = vmatpush1.bf16.msra.mxu0 %v6158_v46  ;;  %4071 = vmatpush1.bf16.msra.mxu1 %v6161_v47  ;;  %v6236_v46 = vld [vmem:[#allocation5 + $0xea0] ss:$16 sps:$4 sm:$0xff]   ;;  %v6239_v47 = vld [vmem:[#allocation5 + $0xea8] ss:$16 sps:$4 sm:$0xff]  }
 0x226   :  { %3648 = vmatprep.subr.bf16.mxu0 %v6166_v48  ;;  %4072 = vmatprep.subr.bf16.mxu1 %v6169_v49  ;;  %v6244_v48 = vld [vmem:[#allocation5 + $0xec4] ss:$16 sps:$4 sm:$0xff]   ;;  %v6247_v49 = vld [vmem:[#allocation5 + $0xecc] ss:$16 sps:$4 sm:$0xff]  }
 0x229   :  { %3649 = vmatpush1.bf16.msra.mxu0 %v6164_v50  ;;  %4073 = vmatpush1.bf16.msra.mxu1 %v6167_v51  ;;  %v6242_v50 = vld [vmem:[#allocation5 + $0xec0] ss:$16 sps:$4 sm:$0xff]   ;;  %v6245_v51 = vld [vmem:[#allocation5 + $0xec8] ss:$16 sps:$4 sm:$0xff]  }
 0x22a   :  { %3650 = vmatprep.subr.bf16.mxu0 %v6172_v52  ;;  %4074 = vmatprep.subr.bf16.mxu1 %v6175_v53  ;;  %v6250_v52 = vld [vmem:[#allocation5 + $0xee4] ss:$16 sps:$4 sm:$0xff]   ;;  %v6253_v53 = vld [vmem:[#allocation5 + $0xeec] ss:$16 sps:$4 sm:$0xff]  }
 0x22d   :  { %3651 = vmatpush1.bf16.msra.mxu0 %v6170_v54  ;;  %4075 = vmatpush1.bf16.msra.mxu1 %v6173_v55  ;;  %v6248_v54 = vld [vmem:[#allocation5 + $0xee0] ss:$16 sps:$4 sm:$0xff]   ;;  %v6251_v55 = vld [vmem:[#allocation5 + $0xee8] ss:$16 sps:$4 sm:$0xff]  }
 0x22e   :  { %3652 = vmatprep.subr.bf16.mxu0 %v6178_v56  ;;  %4076 = vmatprep.subr.bf16.mxu1 %v6181_v57  ;;  %v6256_v56 = vld [vmem:[#allocation5 + $0xf04] ss:$16 sps:$4 sm:$0xff]   ;;  %v6259_v57 = vld [vmem:[#allocation5 + $0xf0c] ss:$16 sps:$4 sm:$0xff]  }
 0x231   :  { %3653 = vmatpush1.bf16.msra.mxu0 %v6176_v58  ;;  %4077 = vmatpush1.bf16.msra.mxu1 %v6179_v59  ;;  %v6254_v58 = vld [vmem:[#allocation5 + $0xf00] ss:$16 sps:$4 sm:$0xff]   ;;  %v6257_v59 = vld [vmem:[#allocation5 + $0xf08] ss:$16 sps:$4 sm:$0xff]  }
 0x232   :  { %3654 = vmatprep.subr.bf16.mxu0 %v6184_v60  ;;  %4078 = vmatprep.subr.bf16.mxu1 %v6187_v61  ;;  %v6262_v60 = vld [vmem:[#allocation5 + $0xf24] ss:$16 sps:$4 sm:$0xff]   ;;  %v6265_v61 = vld [vmem:[#allocation5 + $0xf2c] ss:$16 sps:$4 sm:$0xff]  }
 0x235   :  { %3655 = vmatpush1.bf16.msra.mxu0 %v6182_v62  ;;  %4079 = vmatpush1.bf16.msra.mxu1 %v6185_v63  ;;  %v6260_v62 = vld [vmem:[#allocation5 + $0xf20] ss:$16 sps:$4 sm:$0xff]   ;;  %v6263_v63 = vld [vmem:[#allocation5 + $0xf28] ss:$16 sps:$4 sm:$0xff]  }
 0x236   :  { %3656 = vmatprep.subr.bf16.mxu0 %v6190_v0  ;;  %4080 = vmatprep.subr.bf16.mxu1 %v6193_v1  ;;  %v6268_v0 = vld [vmem:[#allocation5 + $0xf44] ss:$16 sps:$4 sm:$0xff]   ;;  %v6271_v1 = vld [vmem:[#allocation5 + $0xf4c] ss:$16 sps:$4 sm:$0xff]  }
 0x239   :  { %3657 = vmatpush1.bf16.msra.mxu0 %v6188_v2  ;;  %4081 = vmatpush1.bf16.msra.mxu1 %v6191_v3  ;;  %v6266_v2 = vld [vmem:[#allocation5 + $0xf40] ss:$16 sps:$4 sm:$0xff]   ;;  %v6269_v3 = vld [vmem:[#allocation5 + $0xf48] ss:$16 sps:$4 sm:$0xff]  }
 0x23a   :  { %3658 = vmatprep.subr.bf16.mxu0 %v6196_v4  ;;  %4082 = vmatprep.subr.bf16.mxu1 %v6199_v5  ;;  %v6274_v4 = vld [vmem:[#allocation5 + $0xf64] ss:$16 sps:$4 sm:$0xff]   ;;  %v6277_v5 = vld [vmem:[#allocation5 + $0xf6c] ss:$16 sps:$4 sm:$0xff]  }
 0x23d   :  { %3659 = vmatpush1.bf16.msra.mxu0 %v6194_v6  ;;  %4083 = vmatpush1.bf16.msra.mxu1 %v6197_v7  ;;  %v6272_v6 = vld [vmem:[#allocation5 + $0xf60] ss:$16 sps:$4 sm:$0xff]   ;;  %v6275_v7 = vld [vmem:[#allocation5 + $0xf68] ss:$16 sps:$4 sm:$0xff]  }
 0x23e   :  { %3660 = vmatprep.subr.bf16.mxu0 %v6202_v8  ;;  %4084 = vmatprep.subr.bf16.mxu1 %v6205_v9  ;;  %v6280_v8 = vld [vmem:[#allocation5 + $0xf84] ss:$16 sps:$4 sm:$0xff]   ;;  %v6283_v9 = vld [vmem:[#allocation5 + $0xf8c] ss:$16 sps:$4 sm:$0xff]  }
 0x241   :  { %3661 = vmatpush1.bf16.msra.mxu0 %v6200_v10  ;;  %4085 = vmatpush1.bf16.msra.mxu1 %v6203_v11  ;;  %v6278_v10 = vld [vmem:[#allocation5 + $0xf80] ss:$16 sps:$4 sm:$0xff]   ;;  %v6281_v11 = vld [vmem:[#allocation5 + $0xf88] ss:$16 sps:$4 sm:$0xff]  }
 0x242   :  { %3683 = vmatprep.subr.bf16.mxu0 %v6208_v14  ;;  %4107 = vmatprep.subr.bf16.mxu1 %v6211_v15  ;;  %v6284_v14 = vld [vmem:[#allocation5 + $0xfa0] ss:$16 sps:$4 sm:$0xff]   ;;  %v6287_v15 = vld [vmem:[#allocation5 + $0xfa8] ss:$16 sps:$4 sm:$0xff]  }
 0x244   :  { %3663 = vmatmul.mubr.bf16.vlgmr.msra.gmra.mrb[0].mxu0 %v198_v16  ;;  %4087 = vmatmul.mubr.bf16.vlgmr.msra.gmra.mrb[0].mxu1 %v198_v16  ;;  %v6292_v16 = vld [vmem:[#allocation5 + $0xfc4] ss:$16 sps:$4 sm:$0xff]  }
 0x245   :  { %3684 = vmatpush1.bf16.msra.mxu0 %v6206_v19  ;;  %4108 = vmatpush1.bf16.msra.mxu1 %v6209_v20  ;;  %v6293_v19 = vld [vmem:[#allocation5 + $0xfc8] ss:$16 sps:$4 sm:$0xff]   ;;  %v6298_v20 = vld [vmem:[#allocation5 + $0xfe4] ss:$16 sps:$4 sm:$0xff]  }
 0x246   :  { %3685 = vmatprep.subr.bf16.mxu0 %v6214_v21  ;;  %4109 = vmatprep.subr.bf16.mxu1 %v6217_v22  ;;  %v6301_v21 = vld [vmem:[#allocation5 + $0xfec] ss:$16 sps:$4 sm:$0xff]   ;;  %v6296_v22 = vld [vmem:[#allocation5 + $0xfe0] ss:$16 sps:$4 sm:$0xff]  }
 0x247   :  { %3672 = vmatprep.mubr.bf16.mxu0 %v215_v23  ;;  %4096 = vmatprep.mubr.bf16.mxu1 %v215_v23  ;;  %v6299_v23 = vld [vmem:[#allocation5 + $0xfe8] ss:$16 sps:$4 sm:$0xff]  }
 0x249   :  { %3686 = vmatpush1.bf16.msra.mxu0 %v6212_v24  ;;  %4110 = vmatpush1.bf16.msra.mxu1 %v6215_v25  ;;  %v136_v24 = vld [vmem:[#allocation3 + $0x70] sm:$0xff] }
 0x24a   :  { %3687 = vmatprep.subr.bf16.mxu0 %v6220_v28  ;;  %4111 = vmatprep.subr.bf16.mxu1 %v6223_v29  ;;  %v152_v25 = vld [vmem:[#allocation3 + $0xf0] sm:$0xff]  ;;  %v6302_v28 = vld [vmem:[#allocation8 + $0x40] sm:$0xff]  }
 0x24b   :  { %v6303_v29 = vld [vmem:[#allocation8 + $0xc0] sm:$0xff]  }
 0x24c   :  { %3673 = vmatmul.mubr.bf16.gmra.mrb[4].mxu0 %v214_v30  ;;  %4097 = vmatmul.mubr.bf16.gmra.mrb[4].mxu1 %v214_v30  ;;  %v200_v30 = vpack.c.bf16 %v152_v25, %v136_v24 }
 0x24d   :  { %3688 = vmatpush1.bf16.msra.mxu0 %v6218_v33  ;;  %4112 = vmatpush1.bf16.msra.mxu1 %v6221_v34  ;;  %v6305_v33 = vld [vmem:[#allocation8 + $0x80] sm:$0xff]   ;;  %v6306_v34 = vld [vmem:[#allocation8 + $0x48] sm:$0xff]  }
 0x24e   :  { %3689 = vmatprep.subr.bf16.mxu0 %v6226_v35  ;;  %4113 = vmatprep.subr.bf16.mxu1 %v6229_v36  ;;  %v6307_v35 = vld [vmem:[#allocation8 + $0xc8] sm:$0xff]  }
 0x24f   :  { %3715 = vmatprep.mubr.bf16.mxu0 %v201_v37  ;;  %4139 = vmatprep.mubr.bf16.mxu1 %v201_v37  ;;  %v168_v36 = vld [vmem:[#allocation3 + $0x170] sm:$0xff] }
 0x250   :  { %v184_v37 = vld [vmem:[#allocation3 + $0x1f0] sm:$0xff] }
 0x251   :  { %3690 = vmatpush1.bf16.msra.mxu0 %v6224_v38  ;;  %4114 = vmatpush1.bf16.msra.mxu1 %v6227_v39  ;;  %v6308_v38 = vld [vmem:[#allocation8 + $0x8] sm:$0xff]  }
 0x252   :  { %3691 = vmatprep.subr.bf16.mxu0 %v6232_v40  ;;  %4115 = vmatprep.subr.bf16.mxu1 %v6235_v41  ;;  %v6309_v39 = vld [vmem:[#allocation8 + $0x88] sm:$0xff]   ;;  %v6310_v40 = vld [vmem:[#allocation8 + $0x50] sm:$0xff]  }
 0x253   :  { %v6311_v41 = vld [vmem:[#allocation8 + $0xd0] sm:$0xff]  }
 0x255   :  { %3692 = vmatpush1.bf16.msra.mxu0 %v6230_v42  ;;  %4116 = vmatpush1.bf16.msra.mxu1 %v6233_v43  ;;  %v216_v42 = vpack.c.bf16 %v184_v37, %v168_v36  ;;  %v6312_v43 = vld [vmem:[#allocation8 + $0x10] sm:$0xff]  }
 0x256   :  { %3693 = vmatprep.subr.bf16.mxu0 %v6238_v44  ;;  %4117 = vmatprep.subr.bf16.mxu1 %v6241_v45  ;;  %v6313_v44 = vld [vmem:[#allocation8 + $0x90] sm:$0xff]   ;;  %v6314_v45 = vld [vmem:[#allocation8 + $0x58] sm:$0xff]  }
 0x259   :  { %3694 = vmatpush1.bf16.msra.mxu0 %v6236_v46  ;;  %4118 = vmatpush1.bf16.msra.mxu1 %v6239_v47  ;;  %v6315_v46 = vld [vmem:[#allocation8 + $0xd8] sm:$0xff]  }
 0x25a   :  { %3695 = vmatprep.subr.bf16.mxu0 %v6244_v48  ;;  %4119 = vmatprep.subr.bf16.mxu1 %v6247_v49  ;;  %v6316_v47 = vld [vmem:[#allocation8 + $0x18] sm:$0xff]   ;;  %v6318_v49 = vld [vmem:[#allocation8 + $0x60] sm:$0xff]  }
 0x25b   :  { %v6317_v48 = vld [vmem:[#allocation8 + $0x98] sm:$0xff]  }
 0x25d   :  { %3696 = vmatpush1.bf16.msra.mxu0 %v6242_v50  ;;  %4120 = vmatpush1.bf16.msra.mxu1 %v6245_v51  ;;  %v6319_v50 = vld [vmem:[#allocation8 + $0xe0] sm:$0xff]  }
 0x25e   :  { %3697 = vmatprep.subr.bf16.mxu0 %v6250_v52  ;;  %4121 = vmatprep.subr.bf16.mxu1 %v6253_v53  ;;  %v6320_v51 = vld [vmem:[#allocation8 + $0x20] sm:$0xff]   ;;  %v6322_v53 = vld [vmem:[#allocation8 + $0x68] sm:$0xff]  }
 0x25f   :  { %v6321_v52 = vld [vmem:[#allocation8 + $0xa0] sm:$0xff]  }
 0x261   :  { %3698 = vmatpush1.bf16.msra.mxu0 %v6248_v54  ;;  %4122 = vmatpush1.bf16.msra.mxu1 %v6251_v55  ;;  %v6323_v54 = vld [vmem:[#allocation8 + $0xe8] sm:$0xff]  }
 0x262   :  { %3699 = vmatprep.subr.bf16.mxu0 %v6256_v56  ;;  %4123 = vmatprep.subr.bf16.mxu1 %v6259_v57  ;;  %v6324_v55 = vld [vmem:[#allocation8 + $0x28] sm:$0xff]   ;;  %v6326_v57 = vld [vmem:[#allocation8 + $0x70] sm:$0xff]  }
 0x263   :  { %v6325_v56 = vld [vmem:[#allocation8 + $0xa8] sm:$0xff]  }
 0x265   :  { %3700 = vmatpush1.bf16.msra.mxu0 %v6254_v58  ;;  %4124 = vmatpush1.bf16.msra.mxu1 %v6257_v59  ;;  %v6327_v58 = vld [vmem:[#allocation8 + $0xf0] sm:$0xff]  }
 0x266   :  { %3701 = vmatprep.subr.bf16.mxu0 %v6262_v60  ;;  %4125 = vmatprep.subr.bf16.mxu1 %v6265_v61  ;;  %v6328_v59 = vld [vmem:[#allocation8 + $0x30] sm:$0xff]   ;;  %v6330_v61 = vld [vmem:[#allocation8 + $0x78] sm:$0xff]  }
 0x267   :  { %v6329_v60 = vld [vmem:[#allocation8 + $0xb0] sm:$0xff]  }
 0x269   :  { %3702 = vmatpush1.bf16.msra.mxu0 %v6260_v62  ;;  %4126 = vmatpush1.bf16.msra.mxu1 %v6263_v63  ;;  %v6331_v62 = vld [vmem:[#allocation8 + $0xf8] sm:$0xff]  }
 0x26a   :  { %3703 = vmatprep.subr.bf16.mxu0 %v6268_v0  ;;  %4127 = vmatprep.subr.bf16.mxu1 %v6271_v1  ;;  %v6332_v63 = vld [vmem:[#allocation8 + $0x38] sm:$0xff]  }
 0x26b   :  { %v6333_v0 = vld [vmem:[#allocation8 + $0xb8] sm:$0xff]  }
 0x26c   :  { %v6334_v1 = vld [vmem:[%s6718_s5] sm:$0xff]  }
 0x26d   :  { %3704 = vmatpush1.bf16.msra.mxu0 %v6266_v2  ;;  %4128 = vmatpush1.bf16.msra.mxu1 %v6269_v3  ;;  %v732_v2 = vlaneseq }
 0x26e   :  { %3705 = vmatprep.subr.bf16.mxu0 %v6274_v4  ;;  %4129 = vmatprep.subr.bf16.mxu1 %v6277_v5 }
 0x26f   :  { %v733_v3 = vshrl.u32 %v732_v2, 7 }
 0x271   :  { %3706 = vmatpush1.bf16.msra.mxu0 %v6272_v6  ;;  %4130 = vmatpush1.bf16.msra.mxu1 %v6275_v7  ;;  %v734_v4 = vsub.s32 0, %v733_v3  ;;  %v742_v5 = vsub.s32 2, %v733_v3  ;;  %v730_v6 = vld [vmem:[#allocation7] sm:$0xf]  ;;  %v738_v7 = vsub.s32 1, %v733_v3 }
 0x272   :  { %3707 = vmatprep.subr.bf16.mxu0 %v6280_v8  ;;  %4131 = vmatprep.subr.bf16.mxu1 %v6283_v9  ;;  %v746_v8 = vsub.s32 3, %v733_v3 }
 0x273   :  { %v735_v9 = vrot.slane %v730_v6, %v734_v4 }
 0x275   :  { %3708 = vmatpush1.bf16.msra.mxu0 %v6278_v10  ;;  %4132 = vmatpush1.bf16.msra.mxu1 %v6281_v11  ;;  %v743_v10 = vrot.slane %v730_v6, %v742_v5  ;;  %v739_v11 = vrot.slane %v730_v6, %v738_v7 }
 0x276   :  { %3709 = vmatprep.subr.bf16.mxu0 %v6286_v12  ;;  %4133 = vmatprep.subr.bf16.mxu1 %v6289_v13  ;;  %v747_v12 = vrot.slane %v730_v6, %v746_v8  ;;  %v6338_v8 = vld [vmem:[%s6718_s5 + $0x20] sm:$0xff]  }
 0x279   :  { %3710 = vmatpush1.bf16.msra.mxu0 %v6284_v14  ;;  %4134 = vmatpush1.bf16.msra.mxu1 %v6287_v15 }
 0x27a   :  { %3711 = vmatprep.subr.bf16.mxu0 %v6292_v16  ;;  %4135 = vmatprep.subr.bf16.mxu1 %v6295_v17 }
 0x27d   :  { %3712 = vmatpush1.bf16.msra.mxu0 %v6290_v18  ;;  %4136 = vmatpush1.bf16.msra.mxu1 %v6293_v19 }
 0x27e   :  { %3713 = vmatprep.subr.bf16.mxu0 %v6298_v20  ;;  %4137 = vmatprep.subr.bf16.mxu1 %v6301_v21 }
 0x281   :  { %3714 = vmatpush1.bf16.msra.mxu0 %v6296_v22  ;;  %4138 = vmatpush1.bf16.msra.mxu1 %v6299_v23 }
 0x282   :  { %5307 = vmatprep.subr.bf16.mxu0 %v6302_v28  ;;  %5335 = vmatprep.subr.bf16.mxu1 %v6303_v29 }
 0x284   :  { %3716 = vmatmul.mubr.bf16.vlgmr.msra.gmra.mrb[0].mxu0 %v200_v30  ;;  %4140 = vmatmul.mubr.bf16.vlgmr.msra.gmra.mrb[0].mxu1 %v200_v30 }
 0x285   :  { %3725 = vmatprep.mubr.bf16.mxu0 %v217_v31  ;;  %4149 = vmatprep.mubr.bf16.mxu1 %v217_v31 }
 0x286   :  { %5308 = vmatpush3.bf16.msra.mxu0 %v6304_v32  ;;  %5336 = vmatpush3.bf16.msra.mxu1 %v6305_v33 }
 0x287   :  { %5309 = vmatprep.subr.bf16.mxu0 %v6306_v34  ;;  %5337 = vmatprep.subr.bf16.mxu1 %v6307_v35 }
 0x28a   :  { %5310 = vmatpush3.bf16.msra.mxu0 %v6308_v38  ;;  %5338 = vmatpush3.bf16.msra.mxu1 %v6309_v39 }
 0x28b   :  { %5311 = vmatprep.subr.bf16.mxu0 %v6310_v40  ;;  %5339 = vmatprep.subr.bf16.mxu1 %v6311_v41 }
 0x28c   :  { %3726 = vmatmul.mubr.bf16.gmra.mrb[4].mxu0 %v216_v42  ;;  %4150 = vmatmul.mubr.bf16.gmra.mrb[4].mxu1 %v216_v42 }
 0x28e   :  { %5312 = vmatpush3.bf16.msra.mxu0 %v6312_v43  ;;  %5340 = vmatpush3.bf16.msra.mxu1 %v6313_v44 }
 0x28f   :  { %5313 = vmatprep.subr.bf16.mxu0 %v6314_v45  ;;  %5341 = vmatprep.subr.bf16.mxu1 %v6315_v46 }
 0x292   :  { %5314 = vmatpush3.bf16.msra.mxu0 %v6316_v47  ;;  %5342 = vmatpush3.bf16.msra.mxu1 %v6317_v48  ;;  %v6335_v47 = vld [vmem:[%s6718_s5 + $0x8] sm:$0xff]  }
 0x293   :  { %5315 = vmatprep.subr.bf16.mxu0 %v6318_v49  ;;  %5343 = vmatprep.subr.bf16.mxu1 %v6319_v50 }
 0x296   :  { %5316 = vmatpush3.bf16.msra.mxu0 %v6320_v51  ;;  %5344 = vmatpush3.bf16.msra.mxu1 %v6321_v52 }
 0x297   :  { %5317 = vmatprep.subr.bf16.mxu0 %v6322_v53  ;;  %5345 = vmatprep.subr.bf16.mxu1 %v6323_v54 }
 0x29a   :  { %5318 = vmatpush3.bf16.msra.mxu0 %v6324_v55  ;;  %5346 = vmatpush3.bf16.msra.mxu1 %v6325_v56 }
 0x29b   :  { %5319 = vmatprep.subr.bf16.mxu0 %v6326_v57  ;;  %5347 = vmatprep.subr.bf16.mxu1 %v6327_v58 }
 0x29e   :  { %5320 = vmatpush3.bf16.msra.mxu0 %v6328_v59  ;;  %5348 = vmatpush3.bf16.msra.mxu1 %v6329_v60 }
 0x29f   :  { %5321 = vmatprep.subr.bf16.mxu0 %v6330_v61  ;;  %5349 = vmatprep.subr.bf16.mxu1 %v6331_v62  ;;  %v6336_v62 = vld [vmem:[%s6718_s5 + $0x10] sm:$0xff]  }
 0x2a2   :  { %5322 = vmatpush3.bf16.msra.mxu0 %v6332_v63  ;;  %5350 = vmatpush3.bf16.msra.mxu1 %v6333_v0 }
 0x2a3   :  { %5373 = vmatprep.subr.bf16.mxu0 %v6334_v1 }
 0x357   :  { %v3717_v13 = vpop.f32.mrb[0].mxu0  ;;  %v4141_v14 = vpop.f32.mrb[0].mxu1 }
 0x358   :  { %v5393_v15 = vadd.f32 %v3717_v13, %v735_v9  ;;  %v5401_v16 = vadd.f32 %v4141_v14, %v743_v10  ;;  %v3719_v17 = vpop.f32.mrb[1].mxu0  ;;  %v4143_v18 = vpop.f32.mrb[1].mxu1  ;;  %v5259_v14 = vld [vmem:[#allocation10] ss:$0 sm:$0xff] }
 0x359   :  { %v5394_v19 = vadd.f32 %v3719_v17, %v739_v11  ;;  %v5402_v20 = vadd.f32 %v4143_v18, %v747_v12  ;;  %v3721_v21 = vpop.f32.mrb[2].mxu0  ;;  %v4145_v22 = vpop.f32.mrb[2].mxu1 }
 0x35a   :  { %v5395_v23 = vadd.f32 %v3721_v21, %v735_v9  ;;  %v5403_v24 = vadd.f32 %v4145_v22, %v743_v10  ;;  %v3723_v25 = vpop.f32.mrb[3].mxu0  ;;  %v4147_v26 = vpop.f32.mrb[3].mxu1  ;;  %v4160_v29 = vmax.f32 %v5393_v15, 0.0  ;;  %v4162_v30 = vmax.f32 %v5401_v16, 0.0 }
 0x35b   :  { %v5396_v27 = vadd.f32 %v3723_v25, %v739_v11  ;;  %v5404_v28 = vadd.f32 %v4147_v26, %v747_v12  ;;  %v4161_v33 = vmax.f32 %v5394_v19, 0.0  ;;  %v4163_v34 = vmax.f32 %v5402_v20, 0.0 }
 0x35c   :  { %v4164_v31 = vmax.f32 %v5395_v23, 0.0  ;;  %v4166_v32 = vmax.f32 %v5403_v24, 0.0 }
 0x35d   :  { %v4165_v35 = vmax.f32 %v5396_v27, 0.0  ;;  %v4167_v36 = vmax.f32 %v5404_v28, 0.0 }
 0x35e   :  { %v4176_v37 = vpack.c.bf16 %v4164_v31, %v4160_v29  ;;  %v4178_v38 = vpack.c.bf16 %v4166_v32, %v4162_v30 }
 0x35f   :  { %v4177_v39 = vpack.c.bf16 %v4165_v35, %v4161_v33  ;;  %v4179_v40 = vpack.c.bf16 %v4167_v36, %v4163_v34  ;;  %v3727_v41 = vpop.f32.mrb[4].mxu0  ;;  %v4151_v42 = vpop.f32.mrb[4].mxu1 }
 0x360   :  { %v5397_v43 = vadd.f32 %v3727_v41, %v735_v9  ;;  %v5405_v44 = vadd.f32 %v4151_v42, %v743_v10  ;;  %v3729_v45 = vpop.f32.mrb[5].mxu0  ;;  %v4153_v46 = vpop.f32.mrb[5].mxu1 }
 0x361   :  { %v5398_v48 = vadd.f32 %v3729_v45, %v739_v11  ;;  %v5406_v49 = vadd.f32 %v4153_v46, %v747_v12  ;;  %v3731_v50 = vpop.f32.mrb[6].mxu0  ;;  %v4155_v51 = vpop.f32.mrb[6].mxu1  ;;  %4479 = vmatprep.mubr.bf16.mxu0 %v4177_v39  ;;  %4528 = vmatprep.mubr.bf16.mxu1 %v4179_v40 }
 0x362   :  { %v5399_v52 = vadd.f32 %v3731_v50, %v735_v9  ;;  %v5407_v53 = vadd.f32 %v4155_v51, %v743_v10  ;;  %v3733_v54 = vpop.f32.mrb[7].mxu0  ;;  %v4157_v55 = vpop.f32.mrb[7].mxu1  ;;  %4480 = vmatmul.mubr.bf16.vlgmr.msra.gmra.mrb[8].mxu0 %v4176_v37  ;;  %4529 = vmatmul.mubr.bf16.vlgmr.msra.gmra.mrb[8].mxu1 %v4178_v38  ;;  %v4168_v58 = vmax.f32 %v5397_v43, 0.0  ;;  %v4170_v59 = vmax.f32 %v5405_v44, 0.0  ;;  %v6339_v9 = vld [vmem:[%s6718_s5 + $0x28] sm:$0xff]   ;;  %v6340_v10 = vld [vmem:[%s6718_s5 + $0x30] sm:$0xff]  }
 0x363   :  { %v5400_v56 = vadd.f32 %v3733_v54, %v739_v11  ;;  %v5408_v57 = vadd.f32 %v4157_v55, %v747_v12  ;;  %5374 = vmatpush3.bf16.msra.mxu0 %v6334_v1  ;;  %v4169_v63 = vmax.f32 %v5398_v48, 0.0  ;;  %v4171_v0 = vmax.f32 %v5406_v49, 0.0  ;;  %v6337_v1 = vld [vmem:[%s6718_s5 + $0x18] sm:$0xff]   ;;  %v5292_v51 = vld [vmem:[#allocation11] ss:$0 sm:$0xff] }
 0x364   :  { %v4172_v60 = vmax.f32 %v5399_v52, 0.0  ;;  %v4174_v61 = vmax.f32 %v5407_v53, 0.0  ;;  %5375 = vmatprep.subr.bf16.mxu0 %v6335_v47  ;;  %v6341_v11 = vld [vmem:[%s6718_s5 + $0x38] sm:$0xff]  }
 0x365   :  { %v4173_v2 = vmax.f32 %v5400_v56, 0.0  ;;  %v4175_v3 = vmax.f32 %v5408_v57, 0.0  ;;  %v5301_v57 = vld [vmem:[#allocation13] ss:$0 sm:$0xff] }
 0x366   :  { %v4180_v4 = vpack.c.bf16 %v4172_v60, %v4168_v58  ;;  %v4182_v5 = vpack.c.bf16 %v4174_v61, %v4170_v59 }
 0x367   :  { %v4181_v6 = vpack.c.bf16 %v4173_v2, %v4169_v63  ;;  %v4183_v7 = vpack.c.bf16 %v4175_v3, %v4171_v0  ;;  %5376 = vmatpush3.bf16.msra.mxu0 %v6335_v47 }
 0x368   :  { %5377 = vmatprep.subr.bf16.mxu0 %v6336_v62 }
 0x369   :  { %4487 = vmatprep.mubr.bf16.mxu0 %v4181_v6  ;;  %4536 = vmatprep.mubr.bf16.mxu1 %v4183_v7 }
 0x36a   :  { %4488 = vmatmul.mubr.bf16.gmra.mrb[12].mxu0 %v4180_v4  ;;  %4537 = vmatmul.mubr.bf16.gmra.mrb[12].mxu1 %v4182_v5 }
 0x36b   :  { %5378 = vmatpush3.bf16.msra.mxu0 %v6336_v62 }
 0x36c   :  { %5379 = vmatprep.subr.bf16.mxu0 %v6337_v1 }
 0x36f   :  { %5380 = vmatpush3.bf16.msra.mxu0 %v6337_v1 }
 0x370   :  { %5381 = vmatprep.subr.bf16.mxu0 %v6338_v8 }
 0x373   :  { %5382 = vmatpush3.bf16.msra.mxu0 %v6338_v8 }
 0x374   :  { %5383 = vmatprep.subr.bf16.mxu0 %v6339_v9 }
 0x377   :  { %5384 = vmatpush3.bf16.msra.mxu0 %v6339_v9  ;;  %v5302_v9 = vld [vmem:[#allocation2] ss:$0 sm:$0xff] }
 0x378   :  { %5385 = vmatprep.subr.bf16.mxu0 %v6340_v10 }
 0x37b   :  { %5386 = vmatpush3.bf16.msra.mxu0 %v6340_v10 }
 0x37c   :  { %5387 = vmatprep.subr.bf16.mxu0 %v6341_v11 }
 0x37f   :  { %5388 = vmatpush3.bf16.msra.mxu0 %v6341_v11 }
 0x435   :  { %v5323_v12 = vpop.f32.mrb[8].mxu0  ;;  %v5351_v13 = vpop.f32.mrb[8].mxu1 }
 0x436   :  { %v5324_v15 = vpop.f32.mrb[9].mxu0  ;;  %v5352_v16 = vpop.f32.mrb[9].mxu1 }
 0x437   :  { %v5325_v17 = vadd.f32 %v5324_v15, %v5323_v12  ;;  %v5353_v18 = vadd.f32 %v5352_v16, %v5351_v13  ;;  %v5326_v19 = vpop.f32.mrb[10].mxu0  ;;  %v5354_v20 = vpop.f32.mrb[10].mxu1 }
 0x438   :  { %v5327_v21 = vpop.f32.mrb[11].mxu0  ;;  %v5355_v22 = vpop.f32.mrb[11].mxu1 }
 0x439   :  { %v4482_v23 = vadd.f32 %v5325_v17, %v5259_v14  ;;  %v5328_v24 = vadd.f32 %v5327_v21, %v5326_v19  ;;  %v5356_v25 = vadd.f32 %v5355_v22, %v5354_v20 }
 0x43b   :  { %v4531_v26 = vadd.f32 %v5353_v18, %v4482_v23  ;;  %v4485_v27 = vadd.f32 %v5328_v24, %v5259_v14 }
 0x43d   :  { %v4534_v28 = vadd.f32 %v5356_v25, %v4485_v27  ;;  %v5329_v29 = vpop.f32.mrb[12].mxu0  ;;  %v5357_v30 = vpop.f32.mrb[12].mxu1  ;;  %v4545_v33 = vmax.f32 %v4531_v26, 0.0 }
 0x43e   :  { %v5330_v31 = vpop.f32.mrb[13].mxu0  ;;  %v5358_v32 = vpop.f32.mrb[13].mxu1 }
 0x43f   :  { %v4546_v34 = vmax.f32 %v4534_v28, 0.0  ;;  %v5331_v35 = vadd.f32 %v5330_v31, %v5329_v29  ;;  %v5359_v36 = vadd.f32 %v5358_v32, %v5357_v30  ;;  %v5332_v37 = vpop.f32.mrb[14].mxu0  ;;  %v5360_v38 = vpop.f32.mrb[14].mxu1 }
 0x440   :  { %v5333_v39 = vpop.f32.mrb[15].mxu0  ;;  %v5361_v40 = vpop.f32.mrb[15].mxu1 }
 0x441   :  { %v4490_v41 = vadd.f32 %v5331_v35, %v5259_v14  ;;  %v5334_v42 = vadd.f32 %v5333_v39, %v5332_v37  ;;  %v5362_v43 = vadd.f32 %v5361_v40, %v5360_v38  ;;  %v4549_v44 = vpack.c.bf16 %v4546_v34, %v4545_v33 }
 0x443   :  { %v4539_v45 = vadd.f32 %v5359_v36, %v4490_v41  ;;  %v4493_v46 = vadd.f32 %v5334_v42, %v5259_v14  ;;  %5389 = vmatprep.mubr.bf16.mxu0 %v4549_v44 }
 0x445   :  { %v4542_v47 = vadd.f32 %v5362_v43, %v4493_v46  ;;  %v4547_v48 = vmax.f32 %v4539_v45, 0.0 }
 0x447   :  { %v4548_v49 = vmax.f32 %v4542_v47, 0.0 }
 0x449   :  { %v4550_v50 = vpack.c.bf16 %v4548_v49, %v4547_v48 }
 0x44b   :  { %5390 = vmatmul.mubr.bf16.vlgmr.msra.gmra.mrb[16].mxu0 %v4550_v50 }
 0x51e   :  { %v5391_v52 = vpop.f32.mrb[16].mxu0 }
 0x51f   :  { %v4665_v53 = vadd.f32 %v5391_v52, %v5292_v51  ;;  %v4656_v54 = vpop.f32.mrb[17].mxu0 }
 0x520   :  { %v4657_v55 = vadd.f32 %v5292_v51, %v4656_v54  ;;  %v5392_v56 = vpop.f32.mrb[18].mxu0 }
 0x521   :  { %v4673_v58 = vmax.f32 %v4665_v53, 0.0  ;;  %v4668_v59 = vadd.f32 %v5392_v56, %v5292_v51  ;;  %v4659_v60 = vpop.f32.mrb[19].mxu0 }
 0x522   :  { %v4671_v61 = vmax.f32 %v4657_v55, 0.0  ;;  %v4660_v62 = vadd.f32 %v5292_v51, %v4659_v60 }
 0x523   :  { %v4674_v63 = vmax.f32 %v4668_v59, 0.0  ;;  %v4684_v0 = vmul.f32 %v5301_v57, %v4673_v58 }
 0x524   :  { %v4672_v2 = vmax.f32 %v4660_v62, 0.0  ;;  %v4682_v3 = vmul.f32 %v5301_v57, %v4671_v61 }
 0x525   :  { %v4693_v4 = vsel %vm4686_vm0, %v4684_v0, 0.0  ;;  %v4685_v5 = vmul.f32 %v5301_v57, %v4674_v63 }
 0x526   :  { %4694 = vadd.xlane.f32.xlu1 %v4693_v4  ;;  %v4687_v6 = vsel %vm4686_vm0, %v4682_v3, 0.0  ;;  %v4683_v7 = vmul.f32 %v5301_v57, %v4672_v2 }
 0x527   :  { %4688 = vadd.xlane.f32.xlu0 %v4687_v6  ;;  %v4696_v1 = vsel %vm4686_vm0, %v4685_v5, 0.0 }
 0x528   :  { %v4690_v8 = vsel %vm4686_vm0, %v4683_v7, 0.0 }
 0x52a   :  { %4697 = vadd.xlane.f32.xlu1 %v4696_v1 }
 0x52b   :  { %4691 = vadd.xlane.f32.xlu0 %v4690_v8 }
 0x5b3   :  { %v4695_v10 = vpop.xlane.xlu1 %4694 }
 0x5b4   :  { %v4708_v11 = vadd.f32 %v5302_v9, %v4695_v10  ;;  %v4689_v12 = vpop.xlane.xlu0 %4688 }
 0x5b5   :  { %v4706_v13 = vadd.f32 %v5302_v9, %v4689_v12 }
 0x5b6   :  { %v5305_v14 = vmul.f32 -1.442695, %v4708_v11 }
 0x5b7   :  { %v5303_v15 = vmul.f32 -1.442695, %v4706_v13  ;;  %v4698_v16 = vpop.xlane.xlu1 %4697 }
 0x5b8   :  { %6342 = vpow2.f32 %v5305_v14  ;;  %v4709_v17 = vadd.f32 %v5302_v9, %v4698_v16  ;;  %v4692_v18 = vpop.xlane.xlu0 %4691 }
 0x5b9   :  { %6344 = vpow2.f32 %v5303_v15  ;;  %v4707_v19 = vadd.f32 %v5302_v9, %v4692_v18 }
 0x5ba   :  { %v5306_v20 = vmul.f32 -1.442695, %v4709_v17 }
 0x5bb   :  { %v5304_v21 = vmul.f32 -1.442695, %v4707_v19 }
 0x5bc   :  { %6346 = vpow2.f32 %v5306_v20 }
 0x5bd   :  { %6348 = vpow2.f32 %v5304_v21 }
 0x5c2   :  { %v6343_v22 = vpop.eup %6342 }
 0x5c3   :  { %v6345_v23 = vpop.eup %6344  ;;  %v4724_v24 = vadd.f32 1.0, %v6343_v22 }
 0x5c4   :  { %v4722_v25 = vadd.f32 1.0, %v6345_v23 }
 0x5c5   :  { %6350 = vrcp.f32 %v4724_v24 }
 0x5c6   :  { %v6347_v26 = vpop.eup %6346  ;;  %6352 = vrcp.f32 %v4722_v25 }
 0x5c7   :  { %v6349_v27 = vpop.eup %6348  ;;  %v4725_v28 = vadd.f32 1.0, %v6347_v26 }
 0x5c8   :  { %v4723_v29 = vadd.f32 1.0, %v6349_v27 }
 0x5c9   :  { %6354 = vrcp.f32 %v4725_v28 }
 0x5ca   :  { %6356 = vrcp.f32 %v4723_v29 }
 0x5cf   :  { %v6351_v30 = vpop.eup %6350 }
 0x5d0   :  { %v6353_v31 = vpop.eup %6352  ;;  %4737 = vst.msk [vmem:[%s6722_s9 + $0x10] sm:$0xff] %vm4734_vm1, %v6351_v30 }
 0x5d1   :  { %4735 = vst.msk [vmem:[%s6722_s9] sm:$0xff] %vm4734_vm1, %v6353_v31 }
 0x5d3   :  { %v6355_v32 = vpop.eup %6354 }
 0x5d4   :  { %v6357_v33 = vpop.eup %6356  ;;  %4738 = vst.msk [vmem:[%s6722_s9 + $0x18] sm:$0xff] %vm4734_vm1, %v6355_v32 }
 0x5d5   :  { %4736 = vst.msk [vmem:[%s6722_s9 + $0x8] sm:$0xff] %vm4734_vm1, %v6357_v33 }
 0x5d6   :  { %4743 = vsyncpa [#allocation4], 1 }
 0x5d7   :  { %4744 = vsyncpa [#allocation6], 1 }
 0x5d8   :  { %4745 = vsyncpa [#allocation9], 1 }
 0x5d9   :  { %4746 = vsyncpa [#allocation12], 1 }

</bundles_post_ra>
